<compile_context>
chip_gen: v5e
topology: v5e:2x2
jax: 0.10.0
libtpu: 0.0.40
codegen_flags: <defaults>
</compile_context>

<pallas_src>
import functools

import jax
import jax.numpy as jnp
from jax import lax
from jax.experimental import pallas as pl
from jax.experimental.pallas import tpu as pltpu

INF = 1.0e6
M_PAD = 128          # ground-truth boxes per image, padded to the sublane-tile width
TILE_P_DEFAULT = 512       # match-kernel point tile (lanes); ~3 MiB live intermediates
TILE_LOSS_DEFAULT = 1024   # loss-kernel point tile (lanes)
VMEM_LIMIT = 32 * 1024 * 1024


def _round_up(x, m):
    return (x + m - 1) // m * m


# --------------------------------------------------------------------------
# Kernel A: point-to-box target assignment (computate_point_for_location)
#   inputs : pts  [N, 4, P_pad]  sublanes = (xs, ys, range_lo, range_hi)
#            box  [N, 128, 8]    lanes    = (x0, y0, x1, y1, label, area, 0, 0)
#   output : out  [N, 5, P_pad]  sublanes = (label, l, t, r, b)
#   grid   : (N, P_pad // TILE_P), both axes "parallel"
# --------------------------------------------------------------------------
def _match_kernel(pts_ref, box_ref, out_ref):
    pts = pts_ref[...][0]          # [4, TILE_P]   (points along lanes)
    box = box_ref[...][0]          # [128, 8]      (boxes along sublanes)

    xs = pts[0:1, :]               # [1, TILE_P]
    ys = pts[1:2, :]
    lo = pts[2:3, :]
    hi = pts[3:4, :]

    bx0 = box[:, 0:1]              # [128, 1]
    by0 = box[:, 1:2]
    bx1 = box[:, 2:3]
    by1 = box[:, 3:4]
    blab = box[:, 4:5]
    barea = box[:, 5:6]

    # regression distances of every point to every box: [128 boxes, TILE_P points]
    l = xs - bx0
    t = ys - by0
    r = bx1 - xs
    b = by1 - ys

    mn = jnp.minimum(jnp.minimum(l, t), jnp.minimum(r, b))
    mx = jnp.maximum(jnp.maximum(l, t), jnp.maximum(r, b))
    valid = (mn > 0.0) & (mn >= lo) & (mx <= hi)
    area = jnp.where(valid, barea, INF)                      # [128, TILE_P]

    # argmin over the (sublane) box axis; mostly VPU vreg mins + one XLU sublane reduce.
    v = jnp.min(area, axis=0, keepdims=True)                 # [1, TILE_P]
    m_iota = lax.broadcasted_iota(jnp.int32, area.shape, 0)
    big = jnp.int32(area.shape[0])
    # exact f32 equality is safe here: v is a bit-exact copy of one `area` entry.
    # (do NOT move this path to bf16.)
    idx = jnp.min(jnp.where(area == v, m_iota, big), axis=0, keepdims=True)
    onehot = (m_iota == idx).astype(jnp.float32)             # [128, TILE_P]

    lab = jnp.sum(onehot * blab, axis=0, keepdims=True)      # [1, TILE_P]
    lab = jnp.where(v >= INF, 0.0, lab)
    rl = jnp.sum(onehot * l, axis=0, keepdims=True)
    rt = jnp.sum(onehot * t, axis=0, keepdims=True)
    rr = jnp.sum(onehot * r, axis=0, keepdims=True)
    rb = jnp.sum(onehot * b, axis=0, keepdims=True)

    packed = jnp.concatenate([lab, rl, rt, rr, rb], axis=0)  # [5, TILE_P] lane-dense
    out_ref[...] = packed[None]


def match_targets(xs, ys, lo, hi, bx0, by0, bx1, by1, blab, barea,
                  *, tile_p=TILE_P_DEFAULT):
    """xs/ys/lo/hi: [N, P] f32; box params: [N, M] (M <= 128).
    Returns labels [N, P] and regression targets [N, 4, P] (l, t, r, b)."""
    N, P = xs.shape
    M = bx0.shape[1]
    assert M <= M_PAD  # TODO(synk): M > 128 would need a tiled running-min over boxes.

    P_pad = _round_up(max(P, 128), 128)
    tile_p = min(tile_p, P_pad)
    P_pad = _round_up(P_pad, tile_p)

    pts = jnp.stack([xs, ys, lo, hi], axis=1).astype(jnp.float32)    # [N, 4, P]
    pts = jnp.pad(pts, ((0, 0), (0, 0), (0, P_pad - P)))

    def padm(a, fill):
        return jnp.pad(a.astype(jnp.float32), ((0, 0), (0, M_PAD - M)),
                       constant_values=fill)

    zeros = jnp.zeros((N, M_PAD), jnp.float32)
    box = jnp.stack([padm(bx0, 0.0), padm(by0, 0.0), padm(bx1, 0.0), padm(by1, 0.0),
                     padm(blab, 0.0), padm(barea, INF),   # padded boxes never win
                     zeros, zeros], axis=-1)              # [N, 128, 8]

    grid = (N, P_pad // tile_p)
    out = pl.pallas_call(
        _match_kernel,
        out_shape=jax.ShapeDtypeStruct((N, 5, P_pad), jnp.float32),
        grid_spec=pltpu.PrefetchScalarGridSpec(
            num_scalar_prefetch=0,
            grid=grid,
            in_specs=[
                pl.BlockSpec((1, 4, tile_p), lambda n, p: (n, 0, p)),
                pl.BlockSpec((1, M_PAD, 8), lambda n, p: (n, 0, 0)),  # P-invariant
            ],
            out_specs=pl.BlockSpec((1, 5, tile_p), lambda n, p: (n, 0, p)),
        ),
        compiler_params=pltpu.CompilerParams(
            dimension_semantics=("parallel", "parallel"),
            vmem_limit_bytes=VMEM_LIMIT),
    )(pts, box)

    labels = out[:, 0, :P]            # [N, P]
    reg = out[:, 1:5, :P]             # [N, 4, P]  (l, t, r, b)
    return labels, reg


# --------------------------------------------------------------------------
# Kernel B: the three FCOS losses, tiled over the flattened point axis Pt.
#   inputs : cls   [C, Pt_pad]   logits (classes on sublanes, points on lanes)
#            misc  [10, Pt_pad]  rows = (label, tl, tt, tr, tb, pl, pt, pr, pb, ctr)
#   output : per-tile partial sums [num_tiles, 1, 128]
#            lane 0 = cls BCE sum, 1 = weighted IoU sum, 2 = centerness-weight sum,
#            lane 3 = centerness BCE sum (over positives).  Final normalization in JAX.
# --------------------------------------------------------------------------
def _loss_kernel(cls_ref, misc_ref, out_ref, *, n_real):
    logits = cls_ref[...]              # [C, T]
    misc = misc_ref[...]               # [10, T]
    C, T = logits.shape

    lane = lax.broadcasted_iota(jnp.int32, (1, T), 1)
    gidx = pl.program_id(0) * T + lane
    valid = (gidx < n_real).astype(jnp.float32)             # mask padded points

    labels = misc[0:1, :]                                   # [1, T] (0 = background)
    labels_i = labels.astype(jnp.int32)

    # classification loss: sigmoid BCE-with-logits vs one-hot labels (sum here,
    # divided by the real Pt*C outside the kernel).
    cls_id = lax.broadcasted_iota(jnp.int32, (C, T), 0) + 1
    tgt = (cls_id == labels_i).astype(jnp.float32)
    bce = (jnp.maximum(logits, 0.0) - logits * tgt
           + jnp.log(1.0 + jnp.exp(-jnp.abs(logits))))
    cls_sum = jnp.sum(bce * valid, keepdims=True)           # [1, 1]

    pos = (labels > 0.0).astype(jnp.float32) * valid        # [1, T]

    tl = misc[1:2, :]
    tt = misc[2:3, :]
    tr = misc[3:4, :]
    tb = misc[4:5, :]
    pl_ = misc[5:6, :]
    pt_ = misc[6:7, :]
    pr_ = misc[7:8, :]
    pb_ = misc[8:9, :]
    ctr_logit = misc[9:10, :]

    # centerness target (reference has no sqrt); guarded against degenerate boxes.
    lr_min = jnp.minimum(tl, tr)
    lr_max = jnp.maximum(tl, tr)
    td_min = jnp.minimum(tt, tb)
    td_max = jnp.maximum(tt, tb)
    safe_lr = jnp.where(pos > 0.0, jnp.maximum(lr_max, 1e-12), 1.0)
    safe_td = jnp.where(pos > 0.0, jnp.maximum(td_max, 1e-12), 1.0)
    ctr_tgt = (lr_min / safe_lr) * (td_min / safe_td) * pos

    # IoU loss on positives, weighted by centerness target.
    tarea = (tl + tr) * (tt + tb)
    parea = (pl_ + pr_) * (pt_ + pb_)
    w_i = jnp.minimum(pl_, tl) + jnp.minimum(pr_, tr)
    h_i = jnp.minimum(pt_, tt) + jnp.minimum(pb_, tb)
    a_i = w_i * h_i
    a_u = tarea + parea - a_i
    ratio = jnp.where(pos > 0.0, (a_i + 1.0) / (a_u + 1.0), 1.0)
    iou_l = -jnp.log(ratio)

    iou_sum = jnp.sum(iou_l * ctr_tgt, keepdims=True)       # [1, 1]
    wsum = jnp.sum(ctr_tgt, keepdims=True)                  # [1, 1]

    # centerness loss: BCE-with-logits, sum reduction over positives.
    bce_c = (jnp.maximum(ctr_logit, 0.0) - ctr_logit * ctr_tgt
             + jnp.log(1.0 + jnp.exp(-jnp.abs(ctr_logit))))
    ctr_sum = jnp.sum(bce_c * pos, keepdims=True)           # [1, 1]

    lane128 = lax.broadcasted_iota(jnp.int32, (1, 128), 1)
    vec = (jnp.where(lane128 == 0, cls_sum, 0.0)
           + jnp.where(lane128 == 1, iou_sum, 0.0)
           + jnp.where(lane128 == 2, wsum, 0.0)
           + jnp.where(lane128 == 3, ctr_sum, 0.0))
    out_ref[...] = vec[None]                                # [1, 1, 128]


def fcos_losses(cls_t, misc_t, *, tile=TILE_LOSS_DEFAULT):
    """cls_t: [C, Pt] logits; misc_t: [10, Pt] packed side data (lane-major)."""
    C, Pt = cls_t.shape
    Pt_pad = _round_up(max(Pt, 128), 128)
    tile = min(tile, Pt_pad)
    Pt_pad = _round_up(Pt_pad, tile)
    num_tiles = Pt_pad // tile

    cls_p = jnp.pad(cls_t.astype(jnp.float32), ((0, 0), (0, Pt_pad - Pt)))
    misc_p = jnp.pad(misc_t.astype(jnp.float32), ((0, 0), (0, Pt_pad - Pt)))
    n_rows = misc_p.shape[0]

    out = pl.pallas_call(
        functools.partial(_loss_kernel, n_real=Pt),
        out_shape=jax.ShapeDtypeStruct((num_tiles, 1, 128), jnp.float32),
        grid_spec=pltpu.PrefetchScalarGridSpec(
            num_scalar_prefetch=0,
            grid=(num_tiles,),
            in_specs=[
                pl.BlockSpec((C, tile), lambda i: (0, i)),
                pl.BlockSpec((n_rows, tile), lambda i: (0, i)),
            ],
            out_specs=pl.BlockSpec((1, 1, 128), lambda i: (i, 0, 0)),
        ),
        compiler_params=pltpu.CompilerParams(
            dimension_semantics=("parallel",),
            vmem_limit_bytes=VMEM_LIMIT),
    )(cls_p, misc_p)

    partials = jnp.sum(out[:, 0, :], axis=0)                # [128]
    cls_loss = partials[0] / jnp.float32(Pt * C)
    wsum = partials[2]
    denom = jnp.where(wsum > 0.0, wsum, 1.0)
    reg_loss = jnp.where(wsum > 0.0, partials[1] / denom, 0.0)
    ctr_loss = partials[3]
    return cls_loss, reg_loss, ctr_loss


# --------------------------------------------------------------------------
if __name__ == "__main__":
    key = jax.random.PRNGKey(0)

    N = 2                    # batch
    C = 4                    # num classes
    M = 5                    # gt boxes per image
    level_shapes = [(8, 8), (4, 4)]
    strides = [8, 16]
    range_areas = [(-1.0, 64.0), (64.0, 128.0)]   # first two FCOS levels

    # ---- locations per level (row-major over h, w to match NCHW->NHWC flatten) ----
    points = []
    for (h, w), s in zip(level_shapes, strides):
        ygrid, xgrid = jnp.meshgrid(jnp.arange(h) * s + s // 2,
                                    jnp.arange(w) * s + s // 2, indexing="ij")
        pts = jnp.stack([xgrid.reshape(-1), ygrid.reshape(-1)], axis=-1).astype(jnp.float32)
        points.append(pts)
    nums_of_points = [p.shape[0] for p in points]
    P_total = sum(nums_of_points)                  # 64 + 16 = 80
    points_all = jnp.concatenate(points, axis=0)   # [P, 2]

    expanded = jnp.concatenate(
        [jnp.tile(jnp.array(ra, jnp.float32)[None], (n, 1))
         for ra, n in zip(range_areas, nums_of_points)], axis=0)   # [P, 2]

    # ---- targets per image: boxes [M,4], labels [M], areas [M] ----
    k1, k2, k3, k4, k5, k6, k7 = jax.random.split(key, 7)
    x0 = jax.random.uniform(k1, (N, M), minval=0.0, maxval=40.0)
    y0 = jax.random.uniform(k2, (N, M), minval=0.0, maxval=40.0)
    bw = jax.random.uniform(k3, (N, M), minval=8.0, maxval=24.0)
    bh = jax.random.uniform(k4, (N, M), minval=8.0, maxval=24.0)
    x1 = x0 + bw
    y1 = y0 + bh
    blabels = jax.random.randint(k5, (N, M), 1, C + 1).astype(jnp.float32)
    bareas = bw * bh

    # ---- revise offsets (reference accumulates them over images -> cumsum) ----
    revise = jax.random.uniform(k6, (N, P_total, 2), minval=-2.0, maxval=2.0)
    rev_cum = jnp.cumsum(revise, axis=0)
    xs_rev = points_all[None, :, 0] + rev_cum[..., 0]   # [N, P]
    ys_rev = points_all[None, :, 1] + rev_cum[..., 1]
    lo = jnp.tile(expanded[None, :, 0], (N, 1))
    hi = jnp.tile(expanded[None, :, 1], (N, 1))

    labels_nm, reg_nm = match_targets(xs_rev, ys_rev, lo, hi,
                                      x0, y0, x1, y1, blabels, bareas)
    # labels_nm: [N, P],  reg_nm: [N, 4, P]

    # ---- re-order: per level -> concat over batch (matches the module's cats),
    #      producing lane-major [k, Pt] slabs for the loss kernel ----
    lab_parts, regt_parts = [], []
    off = 0
    for n_pts in nums_of_points:
        lab_parts.append(labels_nm[:, off:off + n_pts].reshape(1, -1))             # [1, N*n]
        regt_parts.append(
            jnp.transpose(reg_nm[:, :, off:off + n_pts], (1, 0, 2)).reshape(4, -1))  # [4, N*n]
        off += n_pts
    lab_t = jnp.concatenate(lab_parts, axis=1)       # [1, Pt]
    regt_t = jnp.concatenate(regt_parts, axis=1)     # [4, Pt]

    # ---- predictions per level (NCHW), flattened exactly as the module does and
    #      transposed to lane-major layout ----
    cls_parts, box_parts, ctr_parts = [], [], []
    kk = k7
    for (h, w) in level_shapes:
        kk, ka, kb, kc = jax.random.split(kk, 4)
        cls_l = jax.random.normal(ka, (N, C, h, w), jnp.float32)
        # positive l/t/r/b regression predictions (as produced by the FCOS exp head)
        box_l = jnp.abs(jax.random.normal(kb, (N, 4, h, w), jnp.float32)) * 16.0
        ctr_l = jax.random.normal(kc, (N, 1, h, w), jnp.float32)
        cls_parts.append(jnp.transpose(cls_l, (0, 2, 3, 1)).reshape(-1, C).T)   # [C, N*h*w]
        box_parts.append(jnp.transpose(box_l, (0, 2, 3, 1)).reshape(-1, 4).T)   # [4, N*h*w]
        ctr_parts.append(jnp.transpose(ctr_l, (0, 2, 3, 1)).reshape(-1, 1).T)   # [1, N*h*w]
    cls_t = jnp.concatenate(cls_parts, axis=1)        # [C, Pt]
    boxp_t = jnp.concatenate(box_parts, axis=1)       # [4, Pt]
    ctr_t = jnp.concatenate(ctr_parts, axis=1)        # [1, Pt]

    misc_t = jnp.concatenate([lab_t, regt_t, boxp_t, ctr_t], axis=0)   # [10, Pt]

    cls_loss, reg_loss, ctr_loss = fcos_losses(cls_t, misc_t)

    jax.block_until_ready((cls_loss, reg_loss, ctr_loss))
    # TODO(synk): `overthreshold` is never used in the reference forward; kept out.
    print("KERNEL_OK")
</pallas_src>

<mosaic_0001>
module attributes {stable_mosaic.version = 11 : i64} {
  func.func @_match_kernel(%arg0: i32, %arg1: i32, %arg2: memref<1x4x128xf32, #tpu.memory_space<vmem>>, %arg3: memref<1x128x8xf32, #tpu.memory_space<vmem>>, %arg4: memref<1x5x128xf32, #tpu.memory_space<vmem>>) attributes {dimension_semantics = [#tpu.dimension_semantics<parallel>, #tpu.dimension_semantics<parallel>], iteration_bounds = array<i64: 2, 1>, scalar_prefetch = 0 : i64, scratch_operands = 0 : i64, tpu.core_type = #tpu.core_type<tc>, window_params = [{transform_indices = @transform_0, window_bounds = array<i64: 1, 4, 128>}, {transform_indices = @transform_1, window_bounds = array<i64: 1, 128, 8>}, {transform_indices = @transform_2, window_bounds = array<i64: 1, 5, 128>}]} {
    %c0 = arith.constant 0 : index
    %c0_0 = arith.constant 0 : index
    %c0_1 = arith.constant 0 : index
    %0 = vector.load %arg2[%c0, %c0_0, %c0_1] : memref<1x4x128xf32, #tpu.memory_space<vmem>>, vector<1x4x128xf32>
    %1 = vector.shape_cast %0 : vector<1x4x128xf32> to vector<4x128xf32>
    %c0_2 = arith.constant 0 : index
    %c0_3 = arith.constant 0 : index
    %c0_4 = arith.constant 0 : index
    %2 = vector.load %arg3[%c0_2, %c0_3, %c0_4] : memref<1x128x8xf32, #tpu.memory_space<vmem>>, vector<1x128x8xf32>
    %3 = vector.shape_cast %2 : vector<1x128x8xf32> to vector<128x8xf32>
    %4 = vector.extract_strided_slice %1 {offsets = [0, 0], sizes = [1, 128], strides = [1, 1]} : vector<4x128xf32> to vector<1x128xf32>
    %5 = vector.extract_strided_slice %1 {offsets = [1, 0], sizes = [1, 128], strides = [1, 1]} : vector<4x128xf32> to vector<1x128xf32>
    %6 = vector.extract_strided_slice %1 {offsets = [2, 0], sizes = [1, 128], strides = [1, 1]} : vector<4x128xf32> to vector<1x128xf32>
    %7 = vector.extract_strided_slice %1 {offsets = [3, 0], sizes = [1, 128], strides = [1, 1]} : vector<4x128xf32> to vector<1x128xf32>
    %8 = vector.extract_strided_slice %3 {offsets = [0, 0], sizes = [128, 1], strides = [1, 1]} : vector<128x8xf32> to vector<128x1xf32>
    %9 = vector.extract_strided_slice %3 {offsets = [0, 1], sizes = [128, 1], strides = [1, 1]} : vector<128x8xf32> to vector<128x1xf32>
    %10 = vector.extract_strided_slice %3 {offsets = [0, 2], sizes = [128, 1], strides = [1, 1]} : vector<128x8xf32> to vector<128x1xf32>
    %11 = vector.extract_strided_slice %3 {offsets = [0, 3], sizes = [128, 1], strides = [1, 1]} : vector<128x8xf32> to vector<128x1xf32>
    %12 = vector.extract_strided_slice %3 {offsets = [0, 4], sizes = [128, 1], strides = [1, 1]} : vector<128x8xf32> to vector<128x1xf32>
    %13 = vector.extract_strided_slice %3 {offsets = [0, 5], sizes = [128, 1], strides = [1, 1]} : vector<128x8xf32> to vector<128x1xf32>
    %14 = vector.broadcast %4 : vector<1x128xf32> to vector<128x128xf32>
    %15 = vector.broadcast %8 : vector<128x1xf32> to vector<128x128xf32>
    %16 = arith.subf %14, %15 : vector<128x128xf32>
    %17 = vector.broadcast %5 : vector<1x128xf32> to vector<128x128xf32>
    %18 = vector.broadcast %9 : vector<128x1xf32> to vector<128x128xf32>
    %19 = arith.subf %17, %18 : vector<128x128xf32>
    %20 = vector.broadcast %10 : vector<128x1xf32> to vector<128x128xf32>
    %21 = vector.broadcast %4 : vector<1x128xf32> to vector<128x128xf32>
    %22 = arith.subf %20, %21 : vector<128x128xf32>
    %23 = vector.broadcast %11 : vector<128x1xf32> to vector<128x128xf32>
    %24 = vector.broadcast %5 : vector<1x128xf32> to vector<128x128xf32>
    %25 = arith.subf %23, %24 : vector<128x128xf32>
    %26 = arith.minimumf %16, %19 : vector<128x128xf32>
    %27 = arith.minimumf %22, %25 : vector<128x128xf32>
    %28 = arith.minimumf %26, %27 : vector<128x128xf32>
    %29 = arith.maximumf %16, %19 : vector<128x128xf32>
    %30 = arith.maximumf %22, %25 : vector<128x128xf32>
    %31 = arith.maximumf %29, %30 : vector<128x128xf32>
    %cst = arith.constant 0.000000e+00 : f32
    %32 = vector.broadcast %cst : f32 to vector<128x128xf32>
    %33 = arith.cmpf ogt, %28, %32 : vector<128x128xf32>
    %34 = vector.broadcast %6 : vector<1x128xf32> to vector<128x128xf32>
    %35 = arith.cmpf oge, %28, %34 : vector<128x128xf32>
    %36 = arith.andi %33, %35 : vector<128x128xi1>
    %37 = vector.broadcast %7 : vector<1x128xf32> to vector<128x128xf32>
    %38 = arith.cmpf ole, %31, %37 : vector<128x128xf32>
    %39 = arith.andi %36, %38 : vector<128x128xi1>
    %cst_5 = arith.constant 1.000000e+06 : f32
    %40 = vector.shape_cast %13 : vector<128x1xf32> to vector<128x1xf32>
    %41 = vector.broadcast %40 : vector<128x1xf32> to vector<128x128xf32>
    %42 = vector.broadcast %cst_5 : f32 to vector<128x128xf32>
    %43 = arith.select %39, %41, %42 : vector<128x128xi1>, vector<128x128xf32>
    %cst_6 = arith.constant dense<0x7F800000> : vector<128xf32>
    %44 = vector.multi_reduction <minimumf>, %43, %cst_6 [0] : vector<128x128xf32> to vector<128xf32>
    %45 = vector.shape_cast %44 : vector<128xf32> to vector<1x128xf32>
    %46 = tpu.iota {dimensions = array<i32: 0>} : vector<128x128xi32>
    %47 = vector.broadcast %45 : vector<1x128xf32> to vector<128x128xf32>
    %48 = arith.cmpf oeq, %43, %47 : vector<128x128xf32>
    %c128_i32 = arith.constant 128 : i32
    %49 = vector.broadcast %c128_i32 : i32 to vector<128x128xi32>
    %50 = arith.select %48, %46, %49 : vector<128x128xi1>, vector<128x128xi32>
    %cst_7 = arith.constant dense<2147483647> : vector<128xi32>
    %51 = vector.multi_reduction <minsi>, %50, %cst_7 [0] : vector<128x128xi32> to vector<128xi32>
    %52 = vector.shape_cast %51 : vector<128xi32> to vector<1x128xi32>
    %53 = vector.broadcast %52 : vector<1x128xi32> to vector<128x128xi32>
    %54 = arith.cmpi eq, %46, %53 : vector<128x128xi32>
    %55 = arith.extui %54 : vector<128x128xi1> to vector<128x128xi32>
    %56 = arith.sitofp %55 : vector<128x128xi32> to vector<128x128xf32>
    %57 = vector.broadcast %12 : vector<128x1xf32> to vector<128x128xf32>
    %58 = arith.mulf %56, %57 : vector<128x128xf32>
    %cst_8 = arith.constant dense<0.000000e+00> : vector<128xf32>
    %59 = vector.multi_reduction <add>, %58, %cst_8 [0] : vector<128x128xf32> to vector<128xf32>
    %60 = vector.shape_cast %59 : vector<128xf32> to vector<1x128xf32>
    %cst_9 = arith.constant 1.000000e+06 : f32
    %61 = vector.broadcast %cst_9 : f32 to vector<1x128xf32>
    %62 = arith.cmpf oge, %45, %61 : vector<1x128xf32>
    %cst_10 = arith.constant 0.000000e+00 : f32
    %63 = vector.broadcast %cst_10 : f32 to vector<1x128xf32>
    %64 = arith.select %62, %63, %60 : vector<1x128xi1>, vector<1x128xf32>
    %65 = arith.mulf %56, %16 : vector<128x128xf32>
    %cst_11 = arith.constant dense<0.000000e+00> : vector<128xf32>
    %66 = vector.multi_reduction <add>, %65, %cst_11 [0] : vector<128x128xf32> to vector<128xf32>
    %67 = vector.shape_cast %66 : vector<128xf32> to vector<1x128xf32>
    %68 = arith.mulf %56, %19 : vector<128x128xf32>
    %cst_12 = arith.constant dense<0.000000e+00> : vector<128xf32>
    %69 = vector.multi_reduction <add>, %68, %cst_12 [0] : vector<128x128xf32> to vector<128xf32>
    %70 = vector.shape_cast %69 : vector<128xf32> to vector<1x128xf32>
    %71 = arith.mulf %56, %22 : vector<128x128xf32>
    %cst_13 = arith.constant dense<0.000000e+00> : vector<128xf32>
    %72 = vector.multi_reduction <add>, %71, %cst_13 [0] : vector<128x128xf32> to vector<128xf32>
    %73 = vector.shape_cast %72 : vector<128xf32> to vector<1x128xf32>
    %74 = arith.mulf %56, %25 : vector<128x128xf32>
    %cst_14 = arith.constant dense<0.000000e+00> : vector<128xf32>
    %75 = vector.multi_reduction <add>, %74, %cst_14 [0] : vector<128x128xf32> to vector<128xf32>
    %76 = vector.shape_cast %75 : vector<128xf32> to vector<1x128xf32>
    %77 = tpu.concatenate %64, %67, %70, %73, %76 in 0 : vector<1x128xf32>, vector<1x128xf32>, vector<1x128xf32>, vector<1x128xf32>, vector<1x128xf32> -> vector<5x128xf32>
    %78 = vector.shape_cast %77 : vector<5x128xf32> to vector<1x5x128xf32>
    %c0_15 = arith.constant 0 : index
    %c0_16 = arith.constant 0 : index
    %c0_17 = arith.constant 0 : index
    %79 = vector.load %arg4[%c0_15, %c0_16, %c0_17] : memref<1x5x128xf32, #tpu.memory_space<vmem>>, vector<1x5x128xf32>
    tpu.vector_store %arg4[%c0_15, %c0_16, %c0_17], %78 {strides = array<i32>} : memref<1x5x128xf32, #tpu.memory_space<vmem>>, vector<1x5x128xf32>,
    return
  }
  func.func @transform_0(%arg0: i32, %arg1: i32) -> (i32, i32, i32) {
    %c0_i32 = arith.constant 0 : i32
    %c0_i32_0 = arith.constant 0 : i32
    return %arg0, %c0_i32, %arg1 : i32, i32, i32
  }
  func.func @transform_1(%arg0: i32, %arg1: i32) -> (i32, i32, i32) {
    %c0_i32 = arith.constant 0 : i32
    %c0_i32_0 = arith.constant 0 : i32
    %c0_i32_1 = arith.constant 0 : i32
    return %arg0, %c0_i32, %c0_i32_0 : i32, i32, i32
  }
  func.func @transform_2(%arg0: i32, %arg1: i32) -> (i32, i32, i32) {
    %c0_i32 = arith.constant 0 : i32
    %c0_i32_0 = arith.constant 0 : i32
    return %arg0, %c0_i32, %arg1 : i32, i32, i32
  }
}

</mosaic_0001>

<bundles_post_ra>
// kernel: tpu_custom_call.1
= control target key start
LH: loop header
LB: loop body
LE: loop exit
PB: predicated region body
PF: predicated region fallthrough
CT: control target
= control target key end

     0   :  { %s1429_s9 = smov 0   ;;  %s1431_s10 = smov 0   ;;  %s2606_s0 = inlined_call_operand.vmem [shape: f32[2,4,128], index: 0, kind: input, shape index: {}]   ;;  %s2607_s1 = inlined_call_operand.vmem [shape: f32[2,128,8], index: 1, kind: input, shape index: {}]   ;;  %s2608_s2 = inlined_call_operand.vmem [shape: f32[2,5,128], index: 2, kind: output, shape index: {}]  }
   0x1   :  { %s1433_s11 = smov 0  }
   0x2 LB: > { %s24_s12 = sadd.s32 1, %s1401_s10  ;;  %p1310_p0 = scmp.ge.s32.totalorder %s1405_s11, 1  ;;  %s1405_s11 = sphi %s1433_s11, %s12_s11   ;;  %s1401_s10 = sphi %s1431_s10, %s2823_s10   ;;  %s1397_s9 = sphi %s1429_s9, %s2822_s9  }
   0x3   : > { %p26_p1 = scmp.ge.s32.totalorder %s24_s12, 2  ;;  %p140_p2 = scmp.lt.s32.totalorder %s1405_s11, 3 }
   0x5   : > { %s2825_s12 = smov (%p26_p1, %s24_s12), 0  ;;  %p141_p3 = pnand %p1310_p0, %p140_p2 }
   0x7   : > { %144 = sbr.rel (%p141_p3) target bundleno = 468 (0x1d4), region = 28 }
   0xc   : > { %p171_p4 = scmp.lt.s32.totalorder %s1397_s9, 1  ;;  %v1407_v0 = vmov 0   ;;  %v1408_v17 = vmov 1   ;;  %v1409_v18 = vmov 2   ;;  %v1410_v27 = vmov 3  }
   0xd   : > { %1367 = vset.pattern.permute.xlu2 %v1407_v0  ;;  %1366 = vset.pattern.permute.xlu1 %v1407_v0  ;;  %v1411_v58 = vmov 5   ;;  %v1412_v44 = vmov 4  }
   0xe   : > { %1365 = vset.pattern.permute.xlu0 %v1407_v0  ;;  %s2827_s9 = smov (!%p171_p4, %s1397_s9), 1 }
   0xf   : > { %s1333_s13 = sshll.u32 %s2827_s9, 7  ;;  %s1311_s17 = sshll.u32 %s2827_s9, 2 }
  0x10   : > { %s1453_s16 = scalar_lea.vmem %s2607_s1, %s1333_s13  ;;  %s177_s20 = scalar_lea.vmem %s2606_s0, %s1311_s17 }
  0x11   : > { %v1456_v1 = vld [vmem:[%s1453_s16 + $0x20] sm:$0xff]  ;;  %v1459_v2 = vld [vmem:[%s1453_s16 + $0x10] sm:$0xff]  ;;  %v1468_v4 = vld [vmem:[%s1453_s16 + $0x28] sm:$0xff]  ;;  %s1314_s21 = sshll.u32 %s2827_s9, 3 }
  0x12   : > { %230 = vperm.xlu2 %1367, %v1456_v1   ;;  %220 = vperm.xlu1 %1366, %v1459_v2   ;;  %v1464_v3 = vld [vmem:[%s1453_s16] sm:$0xff]  ;;  %v1471_v5 = vld [vmem:[%s1453_s16 + $0x18] sm:$0xff]  ;;  %v1474_v6 = vld [vmem:[%s1453_s16 + $0x8] sm:$0xff]  ;;  %s189_s24 = scalar_lea.vmem %s2608_s2, %s1314_s21 }
  0x13   : > { %210 = vperm.xlu0 %1365, %v1464_v3   ;;  %v1480_v7 = vld [vmem:[%s1453_s16 + $0x40] sm:$0xff]  ;;  %v1483_v8 = vld [vmem:[%s1453_s16 + $0x38] sm:$0xff]  ;;  %v1486_v9 = vld [vmem:[%s1453_s16 + $0x30] sm:$0xff] }
  0x14   : > { %v1492_v10 = vld [vmem:[%s1453_s16 + $0x58] sm:$0xff]  ;;  %v1495_v11 = vld [vmem:[%s1453_s16 + $0x50] sm:$0xff]  ;;  %v1498_v12 = vld [vmem:[%s1453_s16 + $0x48] sm:$0xff] }
  0x15   : > { %v1504_v13 = vld [vmem:[%s1453_s16 + $0x70] sm:$0xff]  ;;  %v1507_v14 = vld [vmem:[%s1453_s16 + $0x68] sm:$0xff]  ;;  %v1510_v15 = vld [vmem:[%s1453_s16 + $0x60] sm:$0xff] }
  0x16   : > { %v1516_v16 = vld [vmem:[%s1453_s16 + $0x78] sm:$0xff]  ;;  %v1565_v29 = vld [vmem:[%s177_s20] sm:$0xf] }
  0x17   : > { %v1568_v30 = vperm.slane %v1565_v29, 0  ;;  %v1571_v31 = vperm.slane %v1565_v29, 1 }
  0x1a   : > { %235 = vperm.xlu2 %1367, %v1468_v4   ;;  %225 = vperm.xlu1 %1366, %v1471_v5  }
  0x1b   : > { %215 = vperm.xlu0 %1365, %v1474_v6  }
  0x22   : > { %250 = vperm.xlu2 %1367, %v1480_v7   ;;  %245 = vperm.xlu1 %1366, %v1483_v8  }
  0x23   : > { %240 = vperm.xlu0 %1365, %v1486_v9  }
  0x2a   : > { %265 = vperm.xlu2 %1367, %v1492_v10   ;;  %260 = vperm.xlu1 %1366, %v1495_v11  }
  0x2b   : > { %255 = vperm.xlu0 %1365, %v1498_v12  }
  0x32   : > { %280 = vperm.xlu2 %1367, %v1504_v13   ;;  %275 = vperm.xlu1 %1366, %v1507_v14  }
  0x33   : > { %270 = vperm.xlu0 %1365, %v1510_v15  }
  0x3a   : > { %1369 = vset.pattern.permute.xlu2 %v1408_v17  ;;  %1368 = vset.pattern.permute.xlu1 %v1408_v17 }
  0x3b   : > { %285 = vperm.xlu0 %1365, %v1516_v16   ;;  %310 = vperm.xlu2 %1369, %v1474_v6  }
  0x3c   : > { %306 = vperm.xlu1 %1368, %v1464_v3  }
  0x43   : > { %1370 = vset.pattern.permute.xlu0 %v1408_v17  ;;  %322 = vperm.xlu2 %1369, %v1456_v1  }
  0x44   : > { %318 = vperm.xlu1 %1368, %v1471_v5   ;;  %314 = vperm.xlu0 %1370, %v1459_v2  }
  0x4b   : > { %330 = vperm.xlu2 %1369, %v1486_v9  }
  0x4c   : > { %326 = vperm.xlu1 %1368, %v1468_v4   ;;  %334 = vperm.xlu0 %1370, %v1483_v8  }
  0x53   : > { %342 = vperm.xlu2 %1369, %v1498_v12  }
  0x54   : > { %338 = vperm.xlu1 %1368, %v1480_v7   ;;  %346 = vperm.xlu0 %1370, %v1495_v11  }
  0x5b   : > { %354 = vperm.xlu2 %1369, %v1510_v15  }
  0x5c   : > { %350 = vperm.xlu1 %1368, %v1492_v10   ;;  %358 = vperm.xlu0 %1370, %v1507_v14  }
  0x63   : > { %366 = vperm.xlu2 %1369, %v1516_v16  }
  0x64   : > { %362 = vperm.xlu1 %1368, %v1504_v13   ;;  %1371 = vset.pattern.permute.xlu0 %v1409_v18 }
  0x65   : > { %386 = vperm.xlu0 %1371, %v1464_v3  }
  0x6b   : > { %1373 = vset.pattern.permute.xlu2 %v1409_v18 }
  0x6c   : > { %1372 = vset.pattern.permute.xlu1 %v1409_v18  ;;  %v231_v19 = vpop.permute.xlu2 %230  ;;  %394 = vperm.xlu2 %1373, %v1459_v2  }
  0x6d   : > { %390 = vperm.xlu1 %1372, %v1474_v6   ;;  %406 = vperm.xlu0 %1371, %v1468_v4   ;;  %v1596_v42 = vsub.f32 %v1568_v30, %v231_v19 }
  0x6f   : > { %2663 = vst [vmem:[#allocation4_spill] sm:$0xff] %v1596_v42 }
  0x74   : > { %v1539_v20 = vpop.permute.xlu2 %235  ;;  %402 = vperm.xlu2 %1373, %v1456_v1  }
  0x75   : > { %398 = vperm.xlu1 %1372, %v1471_v5   ;;  %418 = vperm.xlu0 %1371, %v1480_v7  }
  0x7c   : > { %v1544_v21 = vpop.permute.xlu2 %250  ;;  %414 = vperm.xlu2 %1373, %v1483_v8  }
  0x7d   : > { %410 = vperm.xlu1 %1372, %v1486_v9   ;;  %430 = vperm.xlu0 %1371, %v1492_v10  }
  0x84   : > { %v1549_v22 = vpop.permute.xlu2 %265  ;;  %v1551_v23 = vpop.permute.xlu1 %220  ;;  %426 = vperm.xlu2 %1373, %v1495_v11  }
  0x85   : > { %422 = vperm.xlu1 %1372, %v1498_v12   ;;  %442 = vperm.xlu0 %1371, %v1504_v13   ;;  %v211_v24 = vpop.permute.xlu0 %210  ;;  %v1639_v60 = vsub.f32 %v1568_v30, %v1551_v23 }
  0x86   : > { %v1624_v52 = vsub.f32 %v1568_v30, %v211_v24 }
  0x87   : > { %2667 = vst [vmem:[#allocation8_spill] sm:$0xff] %v1639_v60 }
  0x88   : > { %2665 = vst [vmem:[#allocation6_spill] sm:$0xff] %v1624_v52 }
  0x8c   : > { %v1560_v25 = vpop.permute.xlu2 %280  ;;  %v226_v26 = vpop.permute.xlu1 %225  ;;  %438 = vperm.xlu2 %1373, %v1507_v14  }
  0x8d   : > { %434 = vperm.xlu1 %1372, %v1510_v15   ;;  %1375 = vset.pattern.permute.xlu0 %v1410_v27  ;;  %v216_v28 = vpop.permute.xlu0 %215  ;;  %v1642_v61 = vsub.f32 %v1568_v30, %v226_v26 }
  0x8e   : > { %470 = vperm.xlu0 %1375, %v1474_v6   ;;  %v1574_v32 = vsub.f32 %v1568_v30, %v216_v28 }
  0x8f   : > { %2668 = vst [vmem:[#allocation9_spill] sm:$0xff] %v1642_v61 }
  0x90   : > { %2661 = vst [vmem:[#allocation2_spill] sm:$0xff] %v1574_v32 }
  0x94   : > { %v1576_v33 = vpop.permute.xlu1 %245  ;;  %1374 = vset.pattern.permute.xlu2 %v1410_v27 }
  0x95   : > { %446 = vperm.xlu1 %1372, %v1516_v16   ;;  %v1579_v34 = vpop.permute.xlu0 %240  ;;  %v311_v35 = vpop.permute.xlu2 %310  ;;  %466 = vperm.xlu2 %1374, %v1464_v3  }
  0x96   : > { %v1583_v36 = vsub.f32 %v1571_v31, %v311_v35  ;;  %490 = vperm.xlu0 %1375, %v1486_v9  }
  0x98   : > { %2662 = vst [vmem:[#allocation3_spill] sm:$0xff] %v1583_v36 }
  0x9c   : > { %v1590_v39 = vpop.permute.xlu1 %260 }
  0x9d   : > { %1376 = vset.pattern.permute.xlu1 %v1410_v27  ;;  %v1592_v40 = vpop.permute.xlu0 %255  ;;  %v323_v41 = vpop.permute.xlu2 %322  ;;  %478 = vperm.xlu2 %1374, %v1471_v5  }
  0x9e   : > { %v1599_v43 = vsub.f32 %v1571_v31, %v323_v41  ;;  %474 = vperm.xlu1 %1376, %v1459_v2   ;;  %502 = vperm.xlu0 %1375, %v1498_v12  }
  0xa0   : > { %2664 = vst [vmem:[#allocation5_spill] sm:$0xff] %v1599_v43 }
  0xa4   : > { %v1607_v46 = vpop.permute.xlu1 %275 }
  0xa5   : > { %v1609_v47 = vpop.permute.xlu0 %270  ;;  %v1611_v48 = vpop.permute.xlu2 %330  ;;  %486 = vperm.xlu2 %1374, %v1468_v4  }
  0xa6   : > { %482 = vperm.xlu1 %1376, %v1456_v1   ;;  %514 = vperm.xlu0 %1375, %v1510_v15  }
  0xad   : > { %v1616_v49 = vpop.permute.xlu0 %285  ;;  %v1618_v50 = vpop.permute.xlu2 %342  ;;  %498 = vperm.xlu2 %1374, %v1480_v7  }
  0xae   : > { %494 = vperm.xlu1 %1376, %v1483_v8   ;;  %v307_v51 = vpop.permute.xlu1 %306  ;;  %526 = vperm.xlu0 %1375, %v1516_v16  }
  0xaf   : > { %v1627_v53 = vsub.f32 %v1571_v31, %v307_v51 }
  0xb1   : > { %2666 = vst [vmem:[#allocation7_spill] sm:$0xff] %v1627_v53 }
  0xb5   : > { %v1633_v56 = vpop.permute.xlu2 %354  ;;  %510 = vperm.xlu2 %1374, %v1492_v10  }
  0xb6   : > { %506 = vperm.xlu1 %1376, %v1495_v11   ;;  %v319_v57 = vpop.permute.xlu1 %318  ;;  %1379 = vset.pattern.permute.xlu0 %v1411_v58  ;;  %v315_v59 = vpop.permute.xlu0 %314 }
  0xb7   : > { %v1645_v62 = vsub.f32 %v1571_v31, %v319_v57  ;;  %v1648_v63 = vsub.f32 %v1571_v31, %v315_v59  ;;  %732 = vperm.xlu0 %1379, %v1459_v2  }
  0xb9   : > { %2669 = vst [vmem:[#allocation10_spill] sm:$0xff] %v1645_v62 }
  0xba   : > { %2670 = vst [vmem:[#allocation11_spill] sm:$0xff] %v1648_v63 }
  0xbd   : > { %v1659_v23 = vpop.permute.xlu2 %366  ;;  %522 = vperm.xlu2 %1374, %v1504_v13  }
  0xbe   : > { %518 = vperm.xlu1 %1376, %v1507_v14   ;;  %v1663_v24 = vpop.permute.xlu1 %326  ;;  %v1665_v26 = vpop.permute.xlu0 %334 }
  0xbf   : > { %752 = vperm.xlu0 %1379, %v1483_v8  }
  0xc5   : > { %1378 = vset.pattern.permute.xlu2 %v1411_v58 }
  0xc6   : > { %1377 = vset.pattern.permute.xlu1 %v1411_v58  ;;  %v1668_v27 = vpop.permute.xlu1 %338  ;;  %v1670_v28 = vpop.permute.xlu0 %346  ;;  %728 = vperm.xlu2 %1378, %v1474_v6  }
  0xc7   : > { %v1673_v35 = vpop.permute.xlu2 %394  ;;  %724 = vperm.xlu1 %1377, %v1464_v3   ;;  %764 = vperm.xlu0 %1379, %v1495_v11  }
  0xce   : > { %v1677_v41 = vpop.permute.xlu1 %350  ;;  %v1679_v51 = vpop.permute.xlu0 %358  ;;  %740 = vperm.xlu2 %1378, %v1456_v1  }
  0xcf   : > { %v1682_v57 = vpop.permute.xlu2 %402  ;;  %736 = vperm.xlu1 %1377, %v1471_v5   ;;  %776 = vperm.xlu0 %1379, %v1507_v14  }
  0xd6   : > { %v1686_v58 = vpop.permute.xlu1 %362  ;;  %748 = vperm.xlu2 %1378, %v1486_v9  }
  0xd7   : > { %2671 = vst [vmem:[#allocation12_spill] sm:$0xff] %v1686_v58  ;;  %v1689_v59 = vpop.permute.xlu2 %414  ;;  %744 = vperm.xlu1 %1377, %v1468_v4   ;;  %v387_v45 = vpop.permute.xlu0 %386  ;;  %1380 = vset.pattern.permute.xlu0 %v1412_v44 }
  0xd8   : > { %2672 = vst [vmem:[#allocation13_spill] sm:$0xff] %v1689_v59  ;;  %961 = vperm.xlu0 %1380, %v1464_v3   ;;  %v1708_v3 = vsub.f32 %v387_v45, %v1568_v30  ;;  %v1721_v59 = vperm.slane %v1565_v29, 2 }
  0xda   : > { %2675 = vst [vmem:[#allocation16_spill] sm:$0xff] %v1708_v3 }
  0xde   : > { %760 = vperm.xlu2 %1378, %v1498_v12  }
  0xdf   : > { %v1694_v19 = vpop.permute.xlu2 %426  ;;  %756 = vperm.xlu1 %1377, %v1480_v7   ;;  %v391_v18 = vpop.permute.xlu1 %390 }
  0xe0   : > { %2673 = vst [vmem:[#allocation14_spill] sm:$0xff] %v1694_v19  ;;  %v1697_v38 = vpop.permute.xlu0 %406  ;;  %981 = vperm.xlu0 %1380, %v1468_v4  }
  0xe6   : > { %772 = vperm.xlu2 %1378, %v1510_v15  }
  0xe7   : > { %v1701_v37 = vpop.permute.xlu2 %438  ;;  %768 = vperm.xlu1 %1377, %v1492_v10   ;;  %v399_v17 = vpop.permute.xlu1 %398 }
  0xe8   : > { %2674 = vst [vmem:[#allocation15_spill] sm:$0xff] %v1701_v37  ;;  %v1704_v0 = vpop.permute.xlu0 %418  ;;  %993 = vperm.xlu0 %1380, %v1480_v7   ;;  %v1724_v7 = vperm.slane %v1565_v29, 3 }
  0xee   : > { %784 = vperm.xlu2 %1378, %v1516_v16  }
  0xef   : > { %780 = vperm.xlu1 %1377, %v1504_v13   ;;  %v1712_v55 = vpop.permute.xlu1 %410  ;;  %v467_v4 = vpop.permute.xlu2 %466 }
  0xf0   : > { %2676 = vst [vmem:[#allocation17_spill] sm:$0xff] %v1712_v55  ;;  %v1714_v54 = vpop.permute.xlu0 %430  ;;  %v1717_v19 = vsub.f32 %v467_v4, %v1571_v31  ;;  %1005 = vperm.xlu0 %1380, %v1492_v10   ;;  %v2680_v4 = vmax.f32 %v1624_v52, %v1627_v53 }
  0xf1   : > { %2677 = vst [vmem:[#allocation18_spill] sm:$0xff] %v1714_v54  ;;  %v2679_v54 = vmin.f32 %v1624_v52, %v1627_v53 }
  0xf2   : > { %2678 = vst [vmem:[#allocation19_spill] sm:$0xff] %v1717_v19  ;;  %v561_v45 = vmin.f32 %v1708_v3, %v1717_v19  ;;  %v609_v37 = vmax.f32 %v1708_v3, %v1717_v19  ;;  %v1742_v19 = vsub.f32 %v399_v17, %v1568_v30  ;;  %v2685_v17 = vmin.f32 %v1642_v61, %v1645_v62 }
  0xf3   : > { %v1992_v3 = vsub.f32 %v1571_v31, %v1677_v41 }
  0xf4   : > { %v577_v55 = vmin.f32 %v2679_v54, %v561_v45  ;;  %v625_v10 = vmax.f32 %v2680_v4, %v609_v37  ;;  %2681 = vst [vmem:[#allocation20_spill] sm:$0xff] %v1742_v19 }
  0xf6   : > { %1382 = vset.pattern.permute.xlu2 %v1412_v44  ;;  %vm641_vm0 = vcmp.gt.f32.partialorder %v577_v55, 0.0  ;;  %vm658_vm1 = vcmp.ge.f32.partialorder %v577_v55, %v1721_v59  ;;  %vm691_vm2 = vcmp.le.f32.partialorder %v625_v10, %v1724_v7 }
  0xf7   : > { %1381 = vset.pattern.permute.xlu1 %v1412_v44  ;;  %v1738_v29 = vpop.permute.xlu1 %422  ;;  %v479_v58 = vpop.permute.xlu2 %478  ;;  %969 = vperm.xlu2 %1382, %v1459_v2   ;;  %vm674_vm3 = vmand %vm641_vm0, %vm658_vm1 }
  0xf8   : > { %v1744_v54 = vpop.permute.xlu0 %442  ;;  %v1747_v37 = vsub.f32 %v479_v58, %v1571_v31  ;;  %965 = vperm.xlu1 %1381, %v1474_v6   ;;  %1017 = vperm.xlu0 %1380, %v1504_v13   ;;  %vm1751_vm4 = vmand %vm674_vm3, %vm691_vm2  ;;  %v2686_v58 = vmax.f32 %v1642_v61, %v1645_v62  ;;  %v1836_v61 = vsub.f32 %v1682_v57, %v1568_v30 }
  0xf9   : > { %v2705_v57 = vmax.f32 %v1596_v42, %v1599_v43 }
  0xfa   : > { %2682 = vst [vmem:[#allocation21_spill] sm:$0xff] %v1747_v37  ;;  %v564_v2 = vmin.f32 %v1742_v19, %v1747_v37  ;;  %v612_v55 = vmax.f32 %v1742_v19, %v1747_v37 }
  0xfb   : > { %2699 = vst [vmem:[#allocation26_spill] sm:$0xff] %v1836_v61 }
  0xfc   : > { %v580_v45 = vmin.f32 %v2685_v17, %v564_v2  ;;  %v628_v6 = vmax.f32 %v2686_v58, %v612_v55  ;;  %v1778_v55 = vsub.f32 %v391_v18, %v1568_v30 }
  0xfe   : > { %vm644_vm5 = vcmp.gt.f32.partialorder %v580_v45, 0.0  ;;  %vm661_vm6 = vcmp.ge.f32.partialorder %v580_v45, %v1721_v59  ;;  %vm694_vm7 = vcmp.le.f32.partialorder %v628_v6, %v1724_v7  ;;  %2689 = vst [vmem:[#allocation22_spill] sm:$0xff] %v1778_v55  ;;  %v2692_v6 = vmax.f32 %v1574_v32, %v1583_v36 }
  0xff   : > { %v1767_v13 = vpop.permute.xlu1 %434  ;;  %977 = vperm.xlu2 %1382, %v1456_v1   ;;  %vm677_vm8 = vmand %vm644_vm5, %vm661_vm6  ;;  %v1770_v4 = vpop.permute.xlu2 %486 }
 0x100   : > { %973 = vperm.xlu1 %1381, %v1471_v5   ;;  %v471_v10 = vpop.permute.xlu0 %470  ;;  %vm1773_vm9 = vmand %vm677_vm8, %vm694_vm7  ;;  %v2691_v5 = vmin.f32 %v1574_v32, %v1583_v36  ;;  %v1960_v36 = vsub.f32 %v1697_v38, %v1568_v30  ;;  %v1968_v32 = vsub.f32 %v1571_v31, %v1668_v27 }
 0x101   : > { %v1781_v17 = vsub.f32 %v471_v10, %v1571_v31 }
 0x102   : > { %2718 = vst [vmem:[#allocation39_spill] sm:$0xff] %v1960_v36 }
 0x103   : > { %2690 = vst [vmem:[#allocation23_spill] sm:$0xff] %v1781_v17  ;;  %v562_v45 = vmin.f32 %v1778_v55, %v1781_v17  ;;  %v610_v1 = vmax.f32 %v1778_v55, %v1781_v17  ;;  %v1892_v17 = vsub.f32 %v1568_v30, %v1544_v21  ;;  %v1896_v55 = vsub.f32 %v1568_v30, %v1549_v22 }
 0x104   : > { %v1912_v21 = vsub.f32 %v1568_v30, %v1590_v39  ;;  %v1916_v22 = vsub.f32 %v1568_v30, %v1592_v40  ;;  %v1932_v39 = vsub.f32 %v1571_v31, %v1659_v23  ;;  %v1936_v40 = vsub.f32 %v1770_v4, %v1571_v31  ;;  %2719 = vst [vmem:[#allocation40_spill] sm:$0xff] %v1968_v32 }
 0x105   : > { %v578_v58 = vmin.f32 %v2691_v5, %v562_v45  ;;  %v626_v37 = vmax.f32 %v2692_v6, %v610_v1  ;;  %v1811_v1 = vsub.f32 %v1673_v35, %v1568_v30  ;;  %v2698_v35 = vmax.f32 %v1639_v60, %v1648_v63  ;;  %2710 = vst [vmem:[#allocation31_spill] sm:$0xff] %v1892_v17 }
 0x106   : > { %2714 = vst [vmem:[#allocation35_spill] sm:$0xff] %v1932_v39  ;;  %v1972_v4 = vsub.f32 %v1571_v31, %v1670_v28  ;;  %v566_v38 = vmin.f32 %v1960_v36, %v1936_v40  ;;  %v553_v41 = vmin.f32 %v1892_v17, %v1968_v32  ;;  %v601_v53 = vmax.f32 %v1892_v17, %v1968_v32 }
 0x107   : > { %v1793_v19 = vpop.permute.xlu1 %446  ;;  %989 = vperm.xlu2 %1382, %v1483_v8   ;;  %vm642_vm10 = vcmp.gt.f32.partialorder %v578_v58, 0.0  ;;  %vm659_vm11 = vcmp.ge.f32.partialorder %v578_v58, %v1721_v59  ;;  %vm692_vm12 = vcmp.le.f32.partialorder %v626_v37, %v1724_v7  ;;  %v1803_v10 = vpop.permute.xlu2 %498  ;;  %2695 = vst [vmem:[#allocation24_spill] sm:$0xff] %v1811_v1  ;;  %v614_v52 = vmax.f32 %v1960_v36, %v1936_v40 }
 0x108   : > { %985 = vperm.xlu1 %1381, %v1486_v9   ;;  %vm675_vm13 = vmand %vm642_vm10, %vm659_vm11  ;;  %v1805_v45 = vpop.permute.xlu0 %490  ;;  %2715 = vst [vmem:[#allocation36_spill] sm:$0xff] %v1936_v40  ;;  %v2018_v44 = vsub.f32 %v1803_v10, %v1571_v31  ;;  %v2036_v17 = vsub.f32 %v1704_v0, %v1568_v30  ;;  %v2184_v18 = vsub.f32 %v1793_v19, %v1568_v30 }
 0x109   : > { %vm1799_vm14 = vmand %vm675_vm13, %vm692_vm12 }
 0x10a   : > { %2722 = vst [vmem:[#allocation43_spill] sm:$0xff] %v2018_v44  ;;  %v569_v40 = vmin.f32 %v2036_v17, %v2018_v44 }
 0x10b   : > { %2724 = vst [vmem:[#allocation45_spill] sm:$0xff] %v2036_v17 }
 0x10f   : > { %1001 = vperm.xlu2 %1382, %v1495_v11   ;;  %v1820_v58 = vpop.permute.xlu2 %510  ;;  %v2697_v11 = vmin.f32 %v1639_v60, %v1648_v63  ;;  %v2735_v60 = vld [vmem:[#allocation13_spill] sm:$0xff] }
 0x110   : > { %997 = vperm.xlu1 %1381, %v1498_v12   ;;  %v475_v8 = vpop.permute.xlu1 %474  ;;  %v1822_v6 = vpop.permute.xlu0 %502 }
 0x111   : > { %v1814_v9 = vsub.f32 %v475_v8, %v1571_v31 }
 0x113   : > { %2696 = vst [vmem:[#allocation25_spill] sm:$0xff] %v1814_v9  ;;  %v563_v37 = vmin.f32 %v1811_v1, %v1814_v9  ;;  %v611_v5 = vmax.f32 %v1811_v1, %v1814_v9  ;;  %v2726_v9 = vld [vmem:[#allocation12_spill] sm:$0xff]  ;;  %v2732_v1 = vld [vmem:[#allocation15_spill] sm:$0xff] }
 0x115   : > { %v579_v12 = vmin.f32 %v2697_v11, %v563_v37  ;;  %v627_v62 = vmax.f32 %v2698_v35, %v611_v5  ;;  %v2701_v5 = vmov 0 }
 0x117   : > { %vm643_vm15 = vcmp.gt.f32.partialorder %v579_v12, 0.0  ;;  %vm660_vm0 = vcmp.ge.f32.partialorder %v579_v12, %v1721_v59  ;;  %vm693_vm1 = vcmp.le.f32.partialorder %v627_v62, %v1724_v7  ;;  %1013 = vperm.xlu2 %1382, %v1507_v14   ;;  %v1855_v35 = vpop.permute.xlu2 %522 }
 0x118   : > { %1009 = vperm.xlu1 %1381, %v1510_v15   ;;  %v483_v8 = vpop.permute.xlu1 %482  ;;  %vm676_vm2 = vmand %vm643_vm15, %vm660_vm0  ;;  %v2704_v15 = vmin.f32 %v1596_v42, %v1599_v43  ;;  %v1886_v43 = vsub.f32 %v1571_v31, %v1611_v48  ;;  %v1908_v48 = vsub.f32 %v1568_v30, %v1576_v33  ;;  %v1928_v33 = vsub.f32 %v1568_v30, %v1609_v47 }
 0x119   : > { %v1839_v37 = vsub.f32 %v483_v8, %v1571_v31  ;;  %vm1841_vm3 = vmand %vm676_vm2, %vm693_vm1  ;;  %v1857_v8 = vpop.permute.xlu0 %514  ;;  %v1948_v47 = vsub.f32 %v1571_v31, %v1663_v24 }
 0x11a   : > { %v2702_v5 = vsel %vm1841_vm3, 4294967295, %v2701_v5  ;;  %v2052_v10 = vsub.f32 %v1857_v8, %v1571_v31  ;;  %v2070_v8 = vsub.f32 %v2732_v1, %v1568_v30  ;;  %v2737_v1 = vld [vmem:[#allocation18_spill] sm:$0xff] }
 0x11b   : > { %2700 = vst [vmem:[#allocation27_spill] sm:$0xff] %v1839_v37  ;;  %v565_v62 = vmin.f32 %v1836_v61, %v1839_v37  ;;  %v613_v14 = vmax.f32 %v1836_v61, %v1839_v37 }
 0x11c   : > { %2703 = vst [vmem:[#allocation28_spill] sm:$0xff] %v2702_v5  ;;  %v585_v5 = vmin.f32 %v553_v41, %v569_v40 }
 0x11d   : > { %v581_v11 = vmin.f32 %v2704_v15, %v565_v62  ;;  %v629_v12 = vmax.f32 %v2705_v57, %v613_v14  ;;  %2717 = vst [vmem:[#allocation38_spill] sm:$0xff] %v1948_v47 }
 0x11e   : > { %2728 = vst [vmem:[#allocation47_spill] sm:$0xff] %v2052_v10  ;;  %vm649_vm2 = vcmp.gt.f32.partialorder %v585_v5, 0.0 }
 0x11f   : > { %vm645_vm5 = vcmp.gt.f32.partialorder %v581_v11, 0.0  ;;  %vm662_vm6 = vcmp.ge.f32.partialorder %v581_v11, %v1721_v59  ;;  %vm695_vm7 = vcmp.le.f32.partialorder %v629_v12, %v1724_v7  ;;  %v1878_v12 = vsub.f32 %v1568_v30, %v1539_v20  ;;  %2733 = vst [vmem:[#allocation15_spill] sm:$0xff] %v2070_v8 }
 0x120   : > { %1021 = vperm.xlu1 %1381, %v1516_v16   ;;  %v1862_v37 = vpop.permute.xlu1 %494  ;;  %vm678_vm8 = vmand %vm645_vm5, %vm662_vm6  ;;  %v1868_v15 = vpop.permute.xlu2 %728  ;;  %v1882_v16 = vsub.f32 %v1568_v30, %v1579_v34  ;;  %v1900_v20 = vsub.f32 %v1568_v30, %v1560_v25  ;;  %v1904_v34 = vsub.f32 %v1571_v31, %v1618_v50  ;;  %v1920_v25 = vsub.f32 %v1571_v31, %v1633_v56 }
 0x121   : > { %vm1864_vm10 = vmand %vm678_vm8, %vm695_vm7  ;;  %v1872_v57 = vpop.permute.xlu0 %526  ;;  %2708 = vst [vmem:[#allocation29_spill] sm:$0xff] %v1878_v12  ;;  %v1924_v50 = vsub.f32 %v1568_v30, %v1607_v46  ;;  %v1944_v46 = vsub.f32 %v1568_v30, %v1616_v49  ;;  %v1956_v56 = vsub.f32 %v1571_v31, %v1665_v26  ;;  %v550_v27 = vmin.f32 %v1878_v12, %v1948_v47 }
 0x122   : > { %2711 = vst [vmem:[#allocation32_spill] sm:$0xff] %v1900_v20  ;;  %v554_v23 = vmin.f32 %v1916_v22, %v1904_v34  ;;  %v598_v28 = vmax.f32 %v1878_v12, %v1948_v47  ;;  %v2026_v12 = vsub.f32 %v1738_v29, %v1568_v30  ;;  %v2741_v41 = vmin.f32 %v1882_v16, %v1886_v43 }
 0x123   : > { %2712 = vst [vmem:[#allocation33_spill] sm:$0xff] %v1920_v25  ;;  %v582_v32 = vmin.f32 %v550_v27, %v566_v38  ;;  %v2046_v38 = vsub.f32 %v1571_v31, %v2726_v9  ;;  %vm666_vm5 = vcmp.ge.f32.partialorder %v585_v5, %v1721_v59  ;;  %v2193_v5 = vsub.f32 %v1872_v57, %v1571_v31 }
 0x124   : > { %2713 = vst [vmem:[#allocation34_spill] sm:$0xff] %v1924_v50 }
 0x125   : > { %2716 = vst [vmem:[#allocation37_spill] sm:$0xff] %v1944_v46  ;;  %vm663_vm11 = vcmp.ge.f32.partialorder %v582_v32, %v1721_v59 }
 0x126   : > { %2723 = vst [vmem:[#allocation44_spill] sm:$0xff] %v2026_v12 }
 0x127   : > { %2727 = vst [vmem:[#allocation12_spill] sm:$0xff] %v2046_v38 }
 0x128   : > { %v1870_v14 = vpop.permute.xlu1 %506  ;;  %v741_v11 = vpop.permute.xlu2 %740  ;;  %2749 = vst [vmem:[#allocation18_spill] sm:$0xff] %v2184_v18 }
 0x129   : > { %v1888_v42 = vpop.permute.xlu0 %732  ;;  %v1980_v49 = vsel %vm1864_vm10, %v741_v11, 1000000.0  ;;  %v2002_v11 = vsub.f32 %v1571_v31, %v1679_v51  ;;  %2751 = vst [vmem:[#allocation50_spill] sm:$0xff] %v2193_v5 }
 0x12a   : > { %2709 = vst [vmem:[#allocation30_spill] sm:$0xff] %v1888_v42  ;;  %v2101_v42 = vsub.f32 %v2737_v1, %v1568_v30 }
 0x12b   : > { %2720 = vst [vmem:[#allocation41_spill] sm:$0xff] %v2002_v11  ;;  %v558_v29 = vmin.f32 %v1924_v50, %v2002_v11  ;;  %v606_v0 = vmax.f32 %v1924_v50, %v2002_v11  ;;  %v2074_v11 = vsub.f32 %v1767_v13, %v1568_v30  ;;  %v630_v50 = vmax.f32 %v598_v28, %v614_v52 }
 0x12c   : > { %v2087_v13 = vsub.f32 %v2735_v60, %v1568_v30  ;;  %v2105_v60 = vsub.f32 %v1744_v54, %v1568_v30 }
 0x12d   : > { %2734 = vst [vmem:[#allocation49_spill] sm:$0xff] %v2074_v11  ;;  %v573_v52 = vmin.f32 %v2074_v11, %v2052_v10  ;;  %vm696_vm13 = vcmp.le.f32.partialorder %v630_v50, %v1724_v7  ;;  %v621_v40 = vmax.f32 %v2074_v11, %v2052_v10  ;;  %v2743_v50 = vmin.f32 %v1928_v33, %v1920_v25 }
 0x12e   : > { %2738 = vst [vmem:[#allocation13_spill] sm:$0xff] %v2105_v60 }
 0x12f   : > { %v589_v10 = vmin.f32 %v2743_v50, %v573_v52 }
 0x130   : > { %v1874_v61 = vpop.permute.xlu1 %518  ;;  %v2008_v47 = vpop.permute.xlu2 %748 }
 0x131   : > { %v2020_v51 = vpop.permute.xlu0 %752  ;;  %v2064_v9 = vsub.f32 %v1874_v61, %v1571_v31  ;;  %vm653_vm8 = vcmp.gt.f32.partialorder %v589_v10, 0.0  ;;  %vm670_vm10 = vcmp.ge.f32.partialorder %v589_v10, %v1721_v59  ;;  %v2761_v10 = vmin.f32 %v1900_v20, %v2046_v38  ;;  %v2767_v2 = vld [vmem:[#allocation30_spill] sm:$0xff] }
 0x133   : > { %2731 = vst [vmem:[#allocation48_spill] sm:$0xff] %v2064_v9 }
 0x139   : > { %v725_v26 = vpop.permute.xlu1 %724 }
 0x13a   : > { %v1984_v24 = vsel %vm1751_vm4, %v725_v26, 1000000.0  ;;  %v2006_v26 = vsub.f32 %v1822_v6, %v1571_v31  ;;  %v2040_v6 = vsub.f32 %v1805_v45, %v1571_v31  ;;  %v2729_v45 = vld [vmem:[#allocation17_spill] sm:$0xff]  ;;  %vm646_vm4 = vcmp.gt.f32.partialorder %v582_v32, 0.0 }
 0x13b   : > { %v2058_v62 = vsub.f32 %v2729_v45, %v1568_v30  ;;  %v617_v45 = vmax.f32 %v2036_v17, %v2018_v44  ;;  %v2736_v44 = vld [vmem:[#allocation14_spill] sm:$0xff]  ;;  %vm2112_vm12 = vmand %vm646_vm4, %vm663_vm11 }
 0x13c   : > { %2721 = vst [vmem:[#allocation42_spill] sm:$0xff] %v2006_v26  ;;  %v570_v27 = vmin.f32 %v2026_v12, %v2006_v26  ;;  %v618_v61 = vmax.f32 %v2026_v12, %v2006_v26  ;;  %v2093_v17 = vsub.f32 %v2736_v44, %v1568_v30  ;;  %v574_v12 = vmin.f32 %v2070_v8, %v2064_v9  ;;  %v761_v44 = vpop.permute.xlu2 %760  ;;  %vm712_vm1 = vmand %vm2112_vm12, %vm696_vm13 }
 0x13d   : > { %2725 = vst [vmem:[#allocation46_spill] sm:$0xff] %v2040_v6  ;;  %v567_v63 = vmin.f32 %v2058_v62, %v2040_v6  ;;  %v615_v26 = vmax.f32 %v2058_v62, %v2040_v6  ;;  %v2127_v6 = vpop.permute.xlu0 %764  ;;  %v633_v32 = vmax.f32 %v601_v53, %v617_v45  ;;  %vm2178_vm12 = vmand %vm649_vm2, %vm666_vm5 }
 0x13e   : > { %2730 = vst [vmem:[#allocation17_spill] sm:$0xff] %v2058_v62  ;;  %v586_v28 = vmin.f32 %v554_v23, %v570_v27  ;;  %v2109_v23 = vsub.f32 %v1820_v58, %v1571_v31  ;;  %v2742_v58 = vmax.f32 %v1916_v22, %v1904_v34  ;;  %v622_v62 = vmax.f32 %v2070_v8, %v2064_v9 }
 0x13f   : > { %v2122_v54 = vmin.f32 %v2741_v41, %v567_v63  ;;  %v2137_v63 = vsub.f32 %v1862_v37, %v1571_v31  ;;  %v590_v53 = vmin.f32 %v558_v29, %v574_v12  ;;  %v2155_v37 = vsub.f32 %v1855_v35, %v1571_v31 }
 0x140   : > { %v634_v1 = vmax.f32 %v2742_v58, %v618_v61  ;;  %vm650_vm15 = vcmp.gt.f32.partialorder %v586_v28, 0.0  ;;  %vm667_vm0 = vcmp.ge.f32.partialorder %v586_v28, %v1721_v59  ;;  %v2744_v61 = vmax.f32 %v1882_v16, %v1886_v43 }
 0x141   : > { %v2066_v36 = vpop.permute.xlu1 %736  ;;  %v572_v58 = vmin.f32 %v2101_v42, %v2109_v23  ;;  %v620_v52 = vmax.f32 %v2101_v42, %v2109_v23  ;;  %2745 = vst [vmem:[#allocation14_spill] sm:$0xff] %v2155_v37  ;;  %v2159_v12 = vsub.f32 %v1870_v14, %v1571_v31  ;;  %vm683_vm6 = vmand %vm650_vm15, %vm667_vm0  ;;  %v2169_v27 = vsel %vm1799_vm14, %v1868_v15, 1000000.0 }
 0x142   : > { %v2142_v41 = vmax.f32 %v2744_v61, %v615_v26  ;;  %vm700_vm7 = vcmp.le.f32.partialorder %v634_v1, %v1724_v7  ;;  %v2746_v26 = vmax.f32 %v1928_v33, %v1920_v25  ;;  %v638_v35 = vmax.f32 %v606_v0, %v622_v62 }
 0x143   : > { %v568_v14 = vmin.f32 %v2087_v13, %v2137_v63  ;;  %vm654_vm4 = vcmp.gt.f32.partialorder %v590_v53, 0.0  ;;  %vm671_vm11 = vcmp.ge.f32.partialorder %v590_v53, %v1721_v59  ;;  %vm647_vm14 = vcmp.gt.f32.partialorder %v2122_v54, 0.0  ;;  %vm716_vm13 = vmand %vm683_vm6, %vm700_vm7 }
 0x144   : > { %v637_v29 = vmax.f32 %v2746_v26, %v621_v40  ;;  %vm699_vm15 = vcmp.le.f32.partialorder %v633_v32, %v1724_v7  ;;  %v2750_v15 = vmin.f32 %v1896_v55, %v1992_v3  ;;  %v571_v0 = vmin.f32 %v2093_v17, %v2159_v12  ;;  %v773_v1 = vpop.permute.xlu2 %772  ;;  %vm2216_vm5 = vmand %vm654_vm4, %vm671_vm11 }
 0x145   : > { %vm664_vm0 = vcmp.ge.f32.partialorder %v2122_v54, %v1721_v59  ;;  %v575_v19 = vmin.f32 %v2105_v60, %v2155_v37  ;;  %v616_v31 = vmax.f32 %v2087_v13, %v2137_v63  ;;  %v2211_v57 = vsel %vm716_vm13, %v761_v44, 1000000.0 }
 0x146   : > { %v588_v62 = vmin.f32 %v2750_v15, %v572_v58  ;;  %vm703_vm2 = vcmp.le.f32.partialorder %v637_v29, %v1724_v7  ;;  %vm704_vm6 = vcmp.le.f32.partialorder %v638_v35, %v1724_v7  ;;  %vm697_vm7 = vcmp.le.f32.partialorder %v2142_v41, %v1724_v7  ;;  %v777_v58 = vpop.permute.xlu0 %776  ;;  %vm680_vm13 = vmand %vm647_vm14, %vm664_vm0 }
 0x147   : > { %v2756_v61 = vmin.f32 %v1908_v48, %v1956_v56  ;;  %v2757_v53 = vmax.f32 %v1896_v55, %v1992_v3  ;;  %v619_v9 = vmax.f32 %v2093_v17, %v2159_v12  ;;  %v623_v32 = vmax.f32 %v2105_v60, %v2155_v37 }
 0x148   : > { %vm652_vm4 = vcmp.gt.f32.partialorder %v588_v62, 0.0  ;;  %vm669_vm11 = vcmp.ge.f32.partialorder %v588_v62, %v1721_v59  ;;  %v2759_v29 = vmin.f32 %v1984_v24, %v1980_v49  ;;  %v608_v62 = vmax.f32 %v1944_v46, %v1932_v39 }
 0x149   : > { %v745_v45 = vpop.permute.xlu1 %744  ;;  %v636_v15 = vmax.f32 %v2757_v53, %v620_v52  ;;  %v2758_v52 = vmin.f32 %v1912_v21, %v1972_v4  ;;  %v591_v53 = vmin.f32 %v2761_v10, %v575_v19  ;;  %vm685_vm14 = vmand %vm652_vm4, %vm669_vm11  ;;  %v2763_v19 = vmov 0 }
 0x14a   : > { %v2150_v50 = vsel %vm712_vm1, %v745_v45, 1000000.0  ;;  %vm2202_vm1 = vmand %vm653_vm8, %vm670_vm10  ;;  %v584_v45 = vmin.f32 %v2756_v61, %v568_v14  ;;  %v2760_v61 = vmax.f32 %v1908_v48, %v1956_v56 }
 0x14b   : > { %v804_v28 = vmin.f32 %v2169_v27, %v2150_v50  ;;  %vm715_vm8 = vmand %vm2178_vm12, %vm699_vm15  ;;  %v587_v40 = vmin.f32 %v2758_v52, %v571_v0  ;;  %vm702_vm0 = vcmp.le.f32.partialorder %v636_v15, %v1724_v7  ;;  %vm655_vm4 = vcmp.gt.f32.partialorder %v591_v53, 0.0 }
 0x14c   : > { %vm719_vm10 = vmand %vm2202_vm1, %vm703_vm2  ;;  %v632_v0 = vmax.f32 %v2760_v61, %v616_v31  ;;  %vm648_vm15 = vcmp.gt.f32.partialorder %v584_v45, 0.0  ;;  %vm665_vm1 = vcmp.ge.f32.partialorder %v584_v45, %v1721_v59  ;;  %v624_v31 = vmax.f32 %v2184_v18, %v2193_v5 }
 0x14d   : > { %v808_v44 = vmin.f32 %v804_v28, %v2211_v57  ;;  %v576_v28 = vmin.f32 %v2184_v18, %v2193_v5  ;;  %vm720_vm12 = vmand %vm2216_vm5, %vm704_vm6  ;;  %vm651_vm5 = vcmp.gt.f32.partialorder %v587_v40, 0.0  ;;  %vm668_vm6 = vcmp.ge.f32.partialorder %v587_v40, %v1721_v59 }
 0x14e   : > { %v2268_v35 = vsel %vm720_vm12, %v777_v58, 1000000.0  ;;  %vm2290_vm2 = vmand %vm680_vm13, %vm697_vm7  ;;  %vm672_vm11 = vcmp.ge.f32.partialorder %v591_v53, %v1721_v59  ;;  %v640_v40 = vmax.f32 %v608_v62, %v624_v31 }
 0x14f   : > { %v812_v52 = vmin.f32 %v808_v44, %v2268_v35  ;;  %v2764_v19 = vsel %vm2290_vm2, 4294967295, %v2763_v19  ;;  %v2765_v44 = vmin.f32 %v1944_v46, %v1932_v39  ;;  %vm718_vm7 = vmand %vm685_vm14, %vm702_vm0 }
 0x150   : > { %vm684_vm12 = vmand %vm651_vm5, %vm668_vm6 }
 0x151   : > { %v757_v26 = vpop.permute.xlu1 %756  ;;  %vm688_vm14 = vmand %vm655_vm4, %vm672_vm11 }
 0x152   : > { %v2240_v14 = vsel %vm715_vm8, %v757_v26, 1000000.0  ;;  %v2266_v26 = vsel %vm719_vm10, %v773_v1, 1000000.0  ;;  %v2762_v1 = vmax.f32 %v1912_v21, %v1972_v4  ;;  %vm681_vm8 = vmand %vm648_vm15, %vm665_vm1  ;;  %vm698_vm10 = vcmp.le.f32.partialorder %v632_v0, %v1724_v7  ;;  %v2768_v0 = vld [vmem:[#allocation28_spill] sm:$0xff] }
 0x153   : > { %v807_v30 = vmin.f32 %v2759_v29, %v2240_v14  ;;  %v607_v29 = vmax.f32 %v1900_v20, %v2046_v38  ;;  %vm714_vm3 = vmand %vm681_vm8, %vm698_vm10  ;;  %vm2766_vm1 = vnez %v2764_v19  ;;  %vm2769_vm5 = vnez %v2768_v0 }
 0x154   : > { %v635_v58 = vmax.f32 %v2762_v1, %v619_v9  ;;  %v592_v9 = vmin.f32 %v2765_v44, %v576_v28  ;;  %v2307_v28 = vsel %vm1773_vm9, %v2066_v36, 1000000.0  ;;  %v2313_v45 = vsel %vm2766_vm1, %v2008_v47, 1000000.0 }
 0x155   : > { %v811_v54 = vmin.f32 %v807_v30, %v2266_v26  ;;  %v639_v15 = vmax.f32 %v607_v29, %v623_v32  ;;  %v2316_v32 = vsel %vm714_vm3, %v2020_v51, 1000000.0  ;;  %vm706_vm3 = vcmp.le.f32.partialorder %v640_v40, %v1724_v7  ;;  %v785_v51 = vpop.permute.xlu2 %784 }
 0x156   : > { %vm701_vm13 = vcmp.le.f32.partialorder %v635_v58, %v1724_v7  ;;  %vm656_vm2 = vcmp.gt.f32.partialorder %v592_v9, 0.0  ;;  %vm673_vm15 = vcmp.ge.f32.partialorder %v592_v9, %v1721_v59  ;;  %v806_v36 = vmin.f32 %v2307_v28, %v2316_v32 }
 0x157   : > { %v815_v30 = vmin.f32 %v811_v54, %v812_v52  ;;  %vm717_vm0 = vmand %vm684_vm12, %vm701_vm13  ;;  %vm705_vm9 = vcmp.le.f32.partialorder %v639_v15, %v1724_v7  ;;  %v789_v59 = vsel %vm2769_vm5, %v2767_v2, 1000000.0  ;;  %v824_v44 = vlaneseq }
 0x158   : > { %v2327_v10 = vsel %vm717_vm0, %v2127_v6, 1000000.0  ;;  %vm689_vm6 = vmand %vm656_vm2, %vm673_vm15  ;;  %v805_v47 = vmin.f32 %v789_v59, %v2313_v45 }
 0x159   : > { %v769_v41 = vpop.permute.xlu1 %768  ;;  %vm721_vm8 = vmand %vm688_vm14, %vm705_vm9  ;;  %v2333_v7 = vshrl.u32 %v824_v44, 7 }
 0x15a   : > { %v2318_v61 = vsel %vm718_vm7, %v769_v41, 1000000.0  ;;  %v809_v52 = vmin.f32 %v805_v47, %v2327_v10  ;;  %vm722_vm10 = vmand %vm689_vm6, %vm706_vm3 }
 0x15b   : > { %v810_v53 = vmin.f32 %v806_v36, %v2318_v61  ;;  %v802_v29 = vsel %vm722_vm10, %v785_v51, 1000000.0  ;;  %v2336_v40 = vadd.s32 8, %v2333_v7  ;;  %v2339_v36 = vadd.s32 16, %v2333_v7 }
 0x15c   : > { %v2342_v2 = vadd.s32 24, %v2333_v7  ;;  %v2345_v0 = vadd.s32 32, %v2333_v7  ;;  %v2348_v47 = vadd.s32 40, %v2333_v7  ;;  %v2351_v51 = vadd.s32 48, %v2333_v7 }
 0x15d   : > { %v814_v1 = vmin.f32 %v810_v53, %v802_v29  ;;  %v2354_v53 = vadd.s32 56, %v2333_v7  ;;  %v2374_v44 = vadd.s32 104, %v2333_v7 }
 0x161   : > { %v781_v54 = vpop.permute.xlu1 %780 }
 0x162   : > { %v801_v31 = vsel %vm721_vm8, %v781_v54, 1000000.0  ;;  %v2360_v54 = vadd.s32 72, %v2333_v7 }
 0x163   : > { %v813_v58 = vmin.f32 %v809_v52, %v801_v31  ;;  %v2357_v52 = vadd.s32 64, %v2333_v7 }
 0x165   : > { %v816_v19 = vmin.f32 %v813_v58, %v814_v1  ;;  %v2363_v1 = vadd.s32 80, %v2333_v7  ;;  %v2366_v58 = vadd.s32 88, %v2333_v7 }
 0x167   : > { %v817_v6 = vmin.f32 %v815_v30, %v816_v19 }
 0x169   : > { %v818_v9 = vrot.slane %v817_v6, 4 }
 0x16b   : > { %v819_v62 = vmin.f32 %v817_v6, %v818_v9  ;;  %v2371_v6 = vadd.s32 96, %v2333_v7  ;;  %v2377_v9 = vadd.s32 112, %v2333_v7 }
 0x16d   : > { %v820_v41 = vrot.slane %v819_v62, 2 }
 0x16f   : > { %v821_v15 = vmin.f32 %v819_v62, %v820_v41  ;;  %v2380_v62 = vadd.s32 120, %v2333_v7 }
 0x171   : > { %v822_v30 = vrot.slane %v821_v15, 1  ;;  %2771 = vst [vmem:[#allocation28_spill] sm:$0xff] %v2380_v62 }
 0x173   : > { %v2368_v19 = vmin.f32 %v821_v15, %v822_v30 }
 0x175   : > { %2770 = vst [vmem:[#allocation30_spill] sm:$0xff] %v2368_v19  ;;  %vm841_vm2 = vcmp.eq.f32.partialorder %v1984_v24, %v2368_v19  ;;  %vm842_vm7 = vcmp.eq.f32.partialorder %v2169_v27, %v2368_v19  ;;  %vm843_vm4 = vcmp.eq.f32.partialorder %v789_v59, %v2368_v19  ;;  %vm844_vm11 = vcmp.eq.f32.partialorder %v2307_v28, %v2368_v19 }
 0x176   : > { %vm845_vm12 = vcmp.eq.f32.partialorder %v1980_v49, %v2368_v19  ;;  %vm846_vm13 = vcmp.eq.f32.partialorder %v2150_v50, %v2368_v19  ;;  %vm847_vm15 = vcmp.eq.f32.partialorder %v2313_v45, %v2368_v19  ;;  %vm848_vm1 = vcmp.eq.f32.partialorder %v2316_v32, %v2368_v19 }
 0x177   : > { %vm849_vm14 = vcmp.eq.f32.partialorder %v2240_v14, %v2368_v19  ;;  %vm850_vm0 = vcmp.eq.f32.partialorder %v2211_v57, %v2368_v19  ;;  %vm851_vm9 = vcmp.eq.f32.partialorder %v2327_v10, %v2368_v19  ;;  %vm852_vm5 = vcmp.eq.f32.partialorder %v2318_v61, %v2368_v19 }
 0x178   : > { %vm853_vm6 = vcmp.eq.f32.partialorder %v2266_v26, %v2368_v19  ;;  %vm854_vm3 = vcmp.eq.f32.partialorder %v2268_v35, %v2368_v19  ;;  %vm855_vm8 = vcmp.eq.f32.partialorder %v801_v31, %v2368_v19  ;;  %vm856_vm10 = vcmp.eq.f32.partialorder %v802_v29, %v2368_v19 }
 0x179   : > { %v857_v41 = vsel %vm841_vm2, %v2333_v7, 128  ;;  %v858_v15 = vsel %vm842_vm7, %v2336_v40, 128  ;;  %v859_v30 = vsel %vm843_vm4, %v2339_v36, 128  ;;  %v860_v5 = vsel %vm844_vm11, %v2342_v2, 128 }
 0x17a   : > { %v861_v24 = vsel %vm845_vm12, %v2345_v0, 128  ;;  %v862_v27 = vsel %vm846_vm13, %v2348_v47, 128  ;;  %v863_v59 = vsel %vm847_vm15, %v2351_v51, 128  ;;  %v864_v28 = vsel %vm848_vm1, %v2354_v53, 128 }
 0x17b   : > { %v865_v49 = vsel %vm849_vm14, %v2357_v52, 128  ;;  %v866_v50 = vsel %vm850_vm0, %v2360_v54, 128  ;;  %v867_v45 = vsel %vm851_vm9, %v2363_v1, 128  ;;  %v868_v32 = vsel %vm852_vm5, %v2366_v58, 128 }
 0x17c   : > { %v869_v14 = vsel %vm853_vm6, %v2371_v6, 128  ;;  %v870_v57 = vsel %vm854_vm3, %v2374_v44, 128  ;;  %v871_v10 = vsel %vm855_vm8, %v2377_v9, 128  ;;  %v872_v18 = vsel %vm856_vm10, %v2380_v62, 128 }
 0x17d   : > { %vm873_vm2 = vcmp.lt.s32.totalorder %v857_v41, %v861_v24  ;;  %vm875_vm7 = vcmp.lt.s32.totalorder %v858_v15, %v862_v27  ;;  %vm877_vm4 = vcmp.lt.s32.totalorder %v859_v30, %v863_v59  ;;  %vm879_vm11 = vcmp.lt.s32.totalorder %v860_v5, %v864_v28 }
 0x17e   : > { %v874_v61 = vsel %vm873_vm2, %v857_v41, %v861_v24  ;;  %v876_v26 = vsel %vm875_vm7, %v858_v15, %v862_v27  ;;  %v878_v39 = vsel %vm877_vm4, %v859_v30, %v863_v59  ;;  %v880_v46 = vsel %vm879_vm11, %v860_v5, %v864_v28  ;;  %v970_v59 = vpop.permute.xlu2 %969 }
 0x17f   : > { %vm881_vm12 = vcmp.lt.s32.totalorder %v874_v61, %v865_v49  ;;  %vm883_vm13 = vcmp.lt.s32.totalorder %v876_v26, %v866_v50  ;;  %vm885_vm15 = vcmp.lt.s32.totalorder %v878_v39, %v867_v45  ;;  %vm887_vm1 = vcmp.lt.s32.totalorder %v880_v46, %v868_v32 }
 0x180   : > { %v882_v35 = vsel %vm881_vm12, %v874_v61, %v865_v49  ;;  %v884_v37 = vsel %vm883_vm13, %v876_v26, %v866_v50  ;;  %v886_v31 = vsel %vm885_vm15, %v878_v39, %v867_v45  ;;  %v888_v60 = vsel %vm887_vm1, %v880_v46, %v868_v32  ;;  %v966_v39 = vpop.permute.xlu1 %965  ;;  %v2773_v45 = vld [vmem:[#allocation11_spill] sm:$0xff]  ;;  %v2776_v61 = vld [vmem:[#allocation6_spill] sm:$0xff] }
 0x181   : > { %vm889_vm14 = vcmp.lt.s32.totalorder %v882_v35, %v869_v14  ;;  %vm891_vm0 = vcmp.lt.s32.totalorder %v884_v37, %v870_v57  ;;  %vm893_vm9 = vcmp.lt.s32.totalorder %v886_v31, %v871_v10  ;;  %vm895_vm5 = vcmp.lt.s32.totalorder %v888_v60, %v872_v18 }
 0x182   : > { %v890_v29 = vsel %vm889_vm14, %v882_v35, %v869_v14  ;;  %v892_v19 = vsel %vm891_vm0, %v884_v37, %v870_v57  ;;  %v894_v62 = vsel %vm893_vm9, %v886_v31, %v871_v10  ;;  %v896_v38 = vsel %vm895_vm5, %v888_v60, %v872_v18  ;;  %v962_v37 = vpop.permute.xlu0 %961  ;;  %v2774_v14 = vld [vmem:[#allocation24_spill] sm:$0xff]  ;;  %v2777_v35 = vld [vmem:[#allocation7_spill] sm:$0xff] }
 0x183   : > { %vm897_vm6 = vcmp.lt.s32.totalorder %v890_v29, %v892_v19  ;;  %vm899_vm3 = vcmp.lt.s32.totalorder %v894_v62, %v896_v38 }
 0x184   : > { %v898_v41 = vsel %vm897_vm6, %v890_v29, %v892_v19  ;;  %v900_v5 = vsel %vm899_vm3, %v894_v62, %v896_v38  ;;  %v2655_v38 = vmov 0.0   ;;  %v2772_v62 = vld [vmem:[#allocation8_spill] sm:$0xff] }
 0x185   : > { %vm901_vm8 = vcmp.lt.s32.totalorder %v898_v41, %v900_v5  ;;  %v2778_v29 = vld [vmem:[#allocation16_spill] sm:$0xff] }
 0x186   : > { %v902_v15 = vsel %vm901_vm8, %v898_v41, %v900_v5  ;;  %v2779_v5 = vld [vmem:[#allocation19_spill] sm:$0xff] }
 0x187   : > { %v903_v30 = vrot.slane %v902_v15, 4 }
 0x189   : > { %vm904_vm10 = vcmp.lt.s32.totalorder %v902_v15, %v903_v30 }
 0x18a   : > { %v905_v24 = vsel %vm904_vm10, %v902_v15, %v903_v30 }
 0x18b   : > { %v906_v27 = vrot.slane %v905_v24, 2 }
 0x18d   : > { %vm907_vm2 = vcmp.lt.s32.totalorder %v905_v24, %v906_v27 }
 0x18e   : > { %v908_v46 = vsel %vm907_vm2, %v905_v24, %v906_v27  ;;  %v2780_v24 = vld [vmem:[#allocation2_spill] sm:$0xff] }
 0x18f   : > { %v909_v28 = vrot.slane %v908_v46, 1 }
 0x191   : > { %vm910_vm7 = vcmp.lt.s32.totalorder %v908_v46, %v909_v28 }
 0x192   : > { %v2472_v49 = vsel %vm910_vm7, %v908_v46, %v909_v28  ;;  %v2781_v46 = vld [vmem:[#allocation3_spill] sm:$0xff] }
 0x193   : > { %vm914_vm4 = vcmp.eq.s32.totalorder %v2339_v36, %v2472_v49  ;;  %vm912_vm11 = vcmp.eq.s32.totalorder %v2333_v7, %v2472_v49  ;;  %vm913_vm12 = vcmp.eq.s32.totalorder %v2336_v40, %v2472_v49  ;;  %vm916_vm13 = vcmp.eq.s32.totalorder %v2345_v0, %v2472_v49  ;;  %v974_v7 = vpop.permute.xlu1 %973  ;;  %v2775_v36 = vld [vmem:[#allocation25_spill] sm:$0xff]  ;;  %v2783_v0 = vld [vmem:[#allocation23_spill] sm:$0xff] }
 0x194   : > { %v1317_v60 = vsel %vm914_vm4, 1.0, %v2655_v38  ;;  %v1315_v18 = vsel %vm912_vm11, 1.0, %v2655_v38  ;;  %v1316_v19 = vsel %vm913_vm12, 1.0, %v2655_v38  ;;  %v978_v38 = vpop.permute.xlu2 %977  ;;  %vm917_vm15 = vcmp.eq.s32.totalorder %v2348_v47, %v2472_v49  ;;  %v2790_v47 = vld [vmem:[#allocation20_spill] sm:$0xff] }
 0x195   : > { %v1065_v50 = vmul.f32 %v1317_v60, %v2772_v62  ;;  %v1102_v32 = vmul.f32 %v1317_v60, %v2773_v45  ;;  %v1139_v57 = vmul.f32 %v1317_v60, %v2774_v14  ;;  %v1176_v10 = vmul.f32 %v1317_v60, %v2775_v36  ;;  %v2782_v62 = vld [vmem:[#allocation22_spill] sm:$0xff] }
 0x196   : > { %v1024_v40 = vmul.f32 %v1315_v18, %v962_v37  ;;  %v1063_v26 = vmul.f32 %v1315_v18, %v2776_v61  ;;  %v1100_v31 = vmul.f32 %v1315_v18, %v2777_v35  ;;  %v1137_v41 = vmul.f32 %v1315_v18, %v2778_v29  ;;  %v2785_v35 = vld [vmem:[#allocation4_spill] sm:$0xff] }
 0x197   : > { %v1174_v15 = vmul.f32 %v1315_v18, %v2779_v5  ;;  %v1025_v30 = vmul.f32 %v1316_v19, %v966_v39  ;;  %v1064_v27 = vmul.f32 %v1316_v19, %v2780_v24  ;;  %v1101_v28 = vmul.f32 %v1316_v19, %v2781_v46  ;;  %v2786_v39 = vld [vmem:[#allocation5_spill] sm:$0xff] }
 0x198   : > { %v1138_v45 = vmul.f32 %v1316_v19, %v2782_v62  ;;  %v1175_v14 = vmul.f32 %v1316_v19, %v2783_v0  ;;  %v2784_v36 = vmov 0.0   ;;  %v1026_v20 = vmul.f32 %v1317_v60, %v970_v59  ;;  %v982_v19 = vpop.permute.xlu0 %981 }
 0x199   : > { %v1319_v37 = vsel %vm916_vm13, 1.0, %v2784_v36  ;;  %v1040_v61 = vadd.f32 %v1025_v30, %v1024_v40  ;;  %v1079_v8 = vadd.f32 %v1064_v27, %v1063_v26  ;;  %v1116_v29 = vadd.f32 %v1101_v28, %v1100_v31  ;;  %v2787_v40 = vld [vmem:[#allocation26_spill] sm:$0xff] }
 0x19a   : > { %v1067_v11 = vmul.f32 %v1319_v37, %v2785_v35  ;;  %v1153_v25 = vadd.f32 %v1138_v45, %v1137_v41  ;;  %v1190_v18 = vadd.f32 %v1175_v14, %v1174_v15  ;;  %v1104_v5 = vmul.f32 %v1319_v37, %v2786_v39  ;;  %v2788_v15 = vld [vmem:[#allocation9_spill] sm:$0xff]  ;;  %v2789_v27 = vld [vmem:[#allocation10_spill] sm:$0xff] }
 0x19b   : > { %vm915_vm1 = vcmp.eq.s32.totalorder %v2342_v2, %v2472_v49  ;;  %v1041_v46 = vadd.f32 %v1040_v61, %v1026_v20  ;;  %v1080_v59 = vadd.f32 %v1079_v8, %v1065_v50  ;;  %v1028_v60 = vmul.f32 %v1319_v37, %v978_v38  ;;  %v2791_v2 = vld [vmem:[#allocation21_spill] sm:$0xff]  ;;  %v986_v35 = vpop.permute.xlu1 %985  ;;  %v2792_v38 = vld [vmem:[#allocation27_spill] sm:$0xff] }
 0x19c   : > { %v1318_v24 = vsel %vm915_vm1, 1.0, %v2784_v36  ;;  %v1141_v26 = vmul.f32 %v1319_v37, %v2787_v40  ;;  %v1320_v31 = vsel %vm917_vm15, 1.0, %v2784_v36  ;;  %v1117_v62 = vadd.f32 %v1116_v29, %v1102_v32  ;;  %v990_v29 = vpop.permute.xlu2 %989 }
 0x19d   : > { %v1027_v41 = vmul.f32 %v1318_v24, %v974_v7  ;;  %v1066_v30 = vmul.f32 %v1318_v24, %v2788_v15  ;;  %v1103_v28 = vmul.f32 %v1318_v24, %v2789_v27  ;;  %v1140_v45 = vmul.f32 %v1318_v24, %v2790_v47  ;;  %v2794_v47 = vld [vmem:[#allocation38_spill] sm:$0xff] }
 0x19e   : > { %v1154_v0 = vadd.f32 %v1153_v25, %v1139_v57  ;;  %v1177_v14 = vmul.f32 %v1318_v24, %v2791_v2  ;;  %v1191_v8 = vadd.f32 %v1190_v18, %v1176_v10  ;;  %vm919_vm14 = vcmp.eq.s32.totalorder %v2354_v53, %v2472_v49  ;;  %v2793_v57 = vld [vmem:[#allocation29_spill] sm:$0xff]  ;;  %v2795_v18 = vld [vmem:[#allocation39_spill] sm:$0xff]  ;;  %v2796_v53 = vld [vmem:[#allocation36_spill] sm:$0xff] }
 0x19f   : > { %v1042_v39 = vadd.f32 %v1041_v46, %v1027_v41  ;;  %v1081_v20 = vadd.f32 %v1080_v59, %v1066_v30  ;;  %v1178_v50 = vmul.f32 %v1319_v37, %v2792_v38  ;;  %v1029_v7 = vmul.f32 %v1320_v31, %v982_v19 }
 0x1a0   : > { %v1118_v61 = vadd.f32 %v1117_v62, %v1103_v28  ;;  %v1155_v40 = vadd.f32 %v1154_v0, %v1140_v45  ;;  %v1192_v32 = vadd.f32 %v1191_v8, %v1177_v14  ;;  %v1322_v25 = vsel %vm919_vm14, 1.0, %v2784_v36  ;;  %v994_v45 = vpop.permute.xlu0 %993 }
 0x1a1   : > { %v1043_v15 = vadd.f32 %v1042_v39, %v1028_v60  ;;  %v1082_v27 = vadd.f32 %v1081_v20, %v1067_v11  ;;  %v1068_v24 = vmul.f32 %v1320_v31, %v2793_v57  ;;  %v1105_v46 = vmul.f32 %v1320_v31, %v2794_v47  ;;  %v2797_v20 = vld [vmem:[#allocation17_spill] sm:$0xff] }
 0x1a2   : > { %v1119_v59 = vadd.f32 %v1118_v61, %v1104_v5  ;;  %v1156_v10 = vadd.f32 %v1155_v40, %v1141_v26  ;;  %v1142_v41 = vmul.f32 %v1320_v31, %v2795_v18  ;;  %v1179_v30 = vmul.f32 %v1320_v31, %v2796_v53 }
 0x1a3   : > { %v1193_v37 = vadd.f32 %v1192_v32, %v1178_v50  ;;  %vm920_vm0 = vcmp.eq.s32.totalorder %v2357_v52, %v2472_v49  ;;  %v1031_v19 = vmul.f32 %v1322_v25, %v990_v29  ;;  %v1070_v11 = vmul.f32 %v1322_v25, %v1908_v48  ;;  %v998_v38 = vpop.permute.xlu1 %997  ;;  %v2799_v29 = vld [vmem:[#allocation31_spill] sm:$0xff] }
 0x1a4   : > { %v1107_v60 = vmul.f32 %v1322_v25, %v1956_v56  ;;  %v1144_v28 = vmul.f32 %v1322_v25, %v2087_v13  ;;  %v1181_v62 = vmul.f32 %v1322_v25, %v2137_v63  ;;  %vm918_vm9 = vcmp.eq.s32.totalorder %v2351_v51, %v2472_v49  ;;  %v2798_v51 = vld [vmem:[#allocation46_spill] sm:$0xff]  ;;  %v1002_v32 = vpop.permute.xlu2 %1001 }
 0x1a5   : > { %v1044_v5 = vadd.f32 %v1043_v15, %v1029_v7  ;;  %v1083_v26 = vadd.f32 %v1082_v27, %v1068_v24  ;;  %v1321_v31 = vsel %vm918_vm9, 1.0, %v2784_v36  ;;  %v1120_v0 = vadd.f32 %v1119_v59, %v1105_v46  ;;  %v2800_v24 = vld [vmem:[#allocation40_spill] sm:$0xff]  ;;  %v2801_v46 = vld [vmem:[#allocation45_spill] sm:$0xff] }
 0x1a6   : > { %v1157_v2 = vadd.f32 %v1156_v10, %v1142_v41  ;;  %v1194_v14 = vadd.f32 %v1193_v37, %v1179_v30  ;;  %v1030_v39 = vmul.f32 %v1321_v31, %v986_v35  ;;  %v1069_v48 = vmul.f32 %v1321_v31, %v1882_v16  ;;  %v2802_v10 = vld [vmem:[#allocation43_spill] sm:$0xff] }
 0x1a7   : > { %v1106_v56 = vmul.f32 %v1321_v31, %v1886_v43  ;;  %v1143_v13 = vmul.f32 %v1321_v31, %v2797_v20  ;;  %v1323_v63 = vsel %vm920_vm0, 1.0, %v2784_v36  ;;  %v1180_v8 = vmul.f32 %v1321_v31, %v2798_v51 }
 0x1a8   : > { %vm922_vm5 = vcmp.eq.s32.totalorder %v2363_v1, %v2472_v49  ;;  %vm921_vm6 = vcmp.eq.s32.totalorder %v2360_v54, %v2472_v49  ;;  %v1045_v35 = vadd.f32 %v1044_v5, %v1030_v39  ;;  %v1084_v16 = vadd.f32 %v1083_v26, %v1069_v48  ;;  %v2803_v5 = vld [vmem:[#allocation44_spill] sm:$0xff] }
 0x1a9   : > { %v1121_v50 = vadd.f32 %v1120_v0, %v1106_v56  ;;  %v1158_v43 = vadd.f32 %v1157_v2, %v1143_v13  ;;  %v1195_v7 = vadd.f32 %v1194_v14, %v1180_v8  ;;  %v1325_v61 = vsel %vm922_vm5, 1.0, %v2784_v36  ;;  %v2804_v0 = vld [vmem:[#allocation42_spill] sm:$0xff] }
 0x1aa   : > { %vm923_vm3 = vcmp.eq.s32.totalorder %v2366_v58, %v2472_v49  ;;  %v1324_v52 = vsel %vm921_vm6, 1.0, %v2784_v36  ;;  %v1046_v40 = vadd.f32 %v1045_v35, %v1031_v19  ;;  %v1085_v15 = vadd.f32 %v1084_v16, %v1070_v11  ;;  %v1006_v19 = vpop.permute.xlu0 %1005 }
 0x1ab   : > { %v1122_v27 = vadd.f32 %v1121_v50, %v1107_v60  ;;  %v1159_v1 = vadd.f32 %v1158_v43, %v1144_v28  ;;  %vm926_vm8 = vcmp.eq.s32.totalorder %v2377_v9, %v2472_v49  ;;  %v1032_v54 = vmul.f32 %v1323_v63, %v994_v45  ;;  %v1010_v20 = vpop.permute.xlu1 %1009  ;;  %v2808_v9 = vld [vmem:[#allocation49_spill] sm:$0xff] }
 0x1ac   : > { %v1071_v25 = vmul.f32 %v1323_v63, %v2799_v29  ;;  %v1196_v57 = vadd.f32 %v1195_v7, %v1181_v62  ;;  %v1108_v47 = vmul.f32 %v1323_v63, %v2800_v24  ;;  %v1145_v59 = vmul.f32 %v1323_v63, %v2801_v46  ;;  %v1014_v43 = vpop.permute.xlu2 %1013  ;;  %v2809_v46 = vld [vmem:[#allocation15_spill] sm:$0xff] }
 0x1ad   : > { %v1182_v58 = vmul.f32 %v1323_v63, %v2802_v10  ;;  %v1326_v18 = vsel %vm923_vm3, 1.0, %v2784_v36  ;;  %v1034_v41 = vmul.f32 %v1325_v61, %v1002_v32  ;;  %v1073_v53 = vmul.f32 %v1325_v61, %v1912_v21 }
 0x1ae   : > { %v1110_v30 = vmul.f32 %v1325_v61, %v1972_v4  ;;  %v1033_v37 = vmul.f32 %v1324_v52, %v998_v38  ;;  %v1047_v11 = vadd.f32 %v1046_v40, %v1032_v54  ;;  %v1072_v60 = vmul.f32 %v1324_v52, %v1916_v22 }
 0x1af   : > { %v1086_v28 = vadd.f32 %v1085_v15, %v1071_v25  ;;  %v1109_v62 = vmul.f32 %v1324_v52, %v1904_v34  ;;  %v1123_v45 = vadd.f32 %v1122_v27, %v1108_v47  ;;  %v1146_v26 = vmul.f32 %v1324_v52, %v2803_v5  ;;  %v2806_v27 = vld [vmem:[#allocation41_spill] sm:$0xff]  ;;  %v2814_v5 = vld [vmem:[#allocation28_spill] sm:$0xff] }
 0x1b0   : > { %v1160_v31 = vadd.f32 %v1159_v1, %v1145_v59  ;;  %v1183_v2 = vmul.f32 %v1324_v52, %v2804_v0  ;;  %v1048_v14 = vadd.f32 %v1047_v11, %v1033_v37  ;;  %v1197_v48 = vadd.f32 %v1196_v57, %v1182_v58  ;;  %v2807_v57 = vld [vmem:[#allocation33_spill] sm:$0xff]  ;;  %v2812_v11 = vld [vmem:[#allocation32_spill] sm:$0xff] }
 0x1b1   : > { %v1087_v39 = vadd.f32 %v1086_v28, %v1072_v60  ;;  %vm925_vm10 = vcmp.eq.s32.totalorder %v2374_v44, %v2472_v49  ;;  %v1147_v21 = vmul.f32 %v1325_v61, %v2093_v17  ;;  %v1184_v4 = vmul.f32 %v1325_v61, %v2159_v12  ;;  %v2805_v61 = vld [vmem:[#allocation34_spill] sm:$0xff]  ;;  %v2813_v28 = vld [vmem:[#allocation12_spill] sm:$0xff] }
 0x1b2   : > { %v1124_v22 = vadd.f32 %v1123_v45, %v1109_v62  ;;  %v1161_v56 = vadd.f32 %v1160_v31, %v1146_v26  ;;  %v1049_v34 = vadd.f32 %v1048_v14, %v1034_v41  ;;  %v1198_v63 = vadd.f32 %v1197_v48, %v1183_v2  ;;  %v1018_v54 = vpop.permute.xlu0 %1017  ;;  %v2815_v14 = vld [vmem:[#allocation13_spill] sm:$0xff]  ;;  %v2816_v48 = vld [vmem:[#allocation14_spill] sm:$0xff] }
 0x1b3   : > { %v1088_v13 = vadd.f32 %v1087_v39, %v1073_v53  ;;  %v1328_v51 = vsel %vm925_vm10, 1.0, %v2784_v36  ;;  %v1035_v8 = vmul.f32 %v1326_v18, %v1006_v19  ;;  %v1074_v16 = vmul.f32 %v1326_v18, %v1896_v55  ;;  %v1022_v45 = vpop.permute.xlu1 %1021 }
 0x1b4   : > { %v1125_v38 = vadd.f32 %v1124_v22, %v1110_v30  ;;  %v1162_v35 = vadd.f32 %v1161_v56, %v1147_v21  ;;  %v1111_v50 = vmul.f32 %v1326_v18, %v1992_v3  ;;  %v1148_v44 = vmul.f32 %v1326_v18, %v2101_v42 }
 0x1b5   : > { %v1199_v17 = vadd.f32 %v1198_v63, %v1184_v4  ;;  %v1185_v12 = vmul.f32 %v1326_v18, %v2109_v23  ;;  %v1037_v7 = vmul.f32 %v1328_v51, %v1014_v43  ;;  %v1076_v52 = vmul.f32 %v1328_v51, %v2805_v61  ;;  %v2811_v18 = vld [vmem:[#allocation47_spill] sm:$0xff] }
 0x1b6   : > { %v1329_v40 = vsel %vm926_vm8, 1.0, %v2784_v36  ;;  %vm924_vm2 = vcmp.eq.s32.totalorder %v2371_v6, %v2472_v49  ;;  %v1050_v55 = vadd.f32 %v1049_v34, %v1035_v8  ;;  %v1089_v15 = vadd.f32 %v1088_v13, %v1074_v16  ;;  %v2810_v6 = vld [vmem:[#allocation48_spill] sm:$0xff]  ;;  %v2817_v34 = vld [vmem:[#allocation37_spill] sm:$0xff] }
 0x1b7   : > { %v1126_v3 = vadd.f32 %v1125_v38, %v1111_v50  ;;  %v1113_v42 = vmul.f32 %v1328_v51, %v2806_v27  ;;  %v1327_v1 = vsel %vm924_vm2, 1.0, %v2784_v36  ;;  %v1163_v32 = vadd.f32 %v1162_v35, %v1148_v44 }
 0x1b8   : > { %v1200_v23 = vadd.f32 %v1199_v17, %v1185_v12  ;;  %v1036_v29 = vmul.f32 %v1327_v1, %v1010_v20  ;;  %v1075_v25 = vmul.f32 %v1327_v1, %v1928_v33  ;;  %v1112_v24 = vmul.f32 %v1327_v1, %v2807_v57  ;;  %v2820_v17 = vld [vmem:[#allocation50_spill] sm:$0xff] }
 0x1b9   : > { %v1149_v47 = vmul.f32 %v1327_v1, %v2808_v9  ;;  %v1150_v59 = vmul.f32 %v1328_v51, %v2809_v46  ;;  %v1187_v10 = vmul.f32 %v1328_v51, %v2810_v6  ;;  %v1038_v58 = vmul.f32 %v1329_v40, %v1018_v54  ;;  %v2818_v51 = vld [vmem:[#allocation35_spill] sm:$0xff] }
 0x1ba   : > { %v1186_v41 = vmul.f32 %v1327_v1, %v2811_v18  ;;  %v1051_v53 = vadd.f32 %v1050_v55, %v1036_v29  ;;  %v1090_v30 = vadd.f32 %v1089_v15, %v1075_v25  ;;  %v1127_v37 = vadd.f32 %v1126_v3, %v1112_v24 }
 0x1bb   : > { %v1164_v19 = vadd.f32 %v1163_v32, %v1149_v47  ;;  %v1077_v60 = vmul.f32 %v1329_v40, %v2812_v11  ;;  %v1114_v62 = vmul.f32 %v1329_v40, %v2813_v28  ;;  %vm927_vm7 = vcmp.eq.s32.totalorder %v2814_v5, %v2472_v49  ;;  %v2819_v49 = vld [vmem:[#allocation18_spill] sm:$0xff] }
 0x1bc   : > { %v1201_v33 = vadd.f32 %v1200_v23, %v1186_v41  ;;  %v1052_v26 = vadd.f32 %v1051_v53, %v1037_v7  ;;  %v1091_v31 = vadd.f32 %v1090_v30, %v1076_v52  ;;  %v1128_v0 = vadd.f32 %v1127_v37, %v1113_v42 }
 0x1bd   : > { %v1165_v2 = vadd.f32 %v1164_v19, %v1150_v59  ;;  %v1151_v39 = vmul.f32 %v1329_v40, %v2815_v14  ;;  %v1188_v21 = vmul.f32 %v1329_v40, %v2816_v48  ;;  %v1330_v22 = vsel %vm927_vm7, 1.0, %v2784_v36  ;;  %v2821_v19 = vld [vmem:[#allocation30_spill] sm:$0xff] }
 0x1be   : > { %v1202_v4 = vadd.f32 %v1201_v33, %v1187_v10  ;;  %v1039_v56 = vmul.f32 %v1330_v22, %v1022_v45  ;;  %v1053_v20 = vadd.f32 %v1052_v26, %v1038_v58  ;;  %v1078_v13 = vmul.f32 %v1330_v22, %v2817_v34 }
 0x1bf   : > { %v1092_v63 = vadd.f32 %v1091_v31, %v1077_v60  ;;  %v1115_v8 = vmul.f32 %v1330_v22, %v2818_v51  ;;  %v1129_v38 = vadd.f32 %v1128_v0, %v1114_v62  ;;  %v1152_v35 = vmul.f32 %v1330_v22, %v2819_v49 }
 0x1c0   : > { %v1166_v16 = vadd.f32 %v1165_v2, %v1151_v39  ;;  %v1054_v50 = vadd.f32 %v1053_v20, %v1039_v56  ;;  %v1189_v43 = vmul.f32 %v1330_v22, %v2820_v17  ;;  %v1203_v12 = vadd.f32 %v1202_v4, %v1188_v21 }
 0x1c1   : > { %v1093_v44 = vadd.f32 %v1092_v63, %v1078_v13  ;;  %v1130_v7 = vadd.f32 %v1129_v38, %v1115_v8  ;;  %vm1211_vm4 = vcmask 1040384   ;;  %vm1213_vm11 = vcmask 1041408  }
 0x1c2   : > { %v1167_v61 = vadd.f32 %v1166_v16, %v1152_v35  ;;  %v1055_v52 = vrot.slane %v1054_v50, 4  ;;  %v1204_v40 = vadd.f32 %v1203_v12, %v1189_v43  ;;  %vm1061_vm12 = vcmp.ge.f32.partialorder %v2821_v19, 1000000.0 }
 0x1c3   : > { %v1094_v36 = vrot.slane %v1093_v44, 4  ;;  %v1131_v55 = vrot.slane %v1130_v7, 4  ;;  %vm1215_vm13 = vcmask 1042432   ;;  %vm1217_vm15 = vcmask 1043456  }
 0x1c4   : > { %v1168_v15 = vrot.slane %v1167_v61, 4  ;;  %v1056_v3 = vadd.f32 %v1055_v52, %v1054_v50  ;;  %v1205_v42 = vrot.slane %v1204_v40, 4 }
 0x1c5   : > { %v1095_v27 = vadd.f32 %v1094_v36, %v1093_v44  ;;  %v1132_v1 = vadd.f32 %v1131_v55, %v1130_v7 }
 0x1c6   : > { %v1169_v32 = vadd.f32 %v1168_v15, %v1167_v61  ;;  %v1057_v23 = vrot.slane %v1056_v3, 2  ;;  %v1206_v29 = vadd.f32 %v1205_v42, %v1204_v40 }
 0x1c7   : > { %v1096_v54 = vrot.slane %v1095_v27, 2  ;;  %v1133_v25 = vrot.slane %v1132_v1, 2 }
 0x1c8   : > { %v1170_v57 = vrot.slane %v1169_v32, 2  ;;  %v1058_v24 = vadd.f32 %v1057_v23, %v1056_v3  ;;  %v1207_v47 = vrot.slane %v1206_v29, 2 }
 0x1c9   : > { %v1097_v9 = vadd.f32 %v1096_v54, %v1095_v27  ;;  %v1134_v46 = vadd.f32 %v1133_v25, %v1132_v1 }
 0x1ca   : > { %v1171_v59 = vadd.f32 %v1170_v57, %v1169_v32  ;;  %v1059_v6 = vrot.slane %v1058_v24, 1  ;;  %v1208_v58 = vadd.f32 %v1207_v47, %v1206_v29 }
 0x1cb   : > { %v1098_v10 = vrot.slane %v1097_v9, 1  ;;  %v1135_v18 = vrot.slane %v1134_v46, 1 }
 0x1cc   : > { %v1172_v41 = vrot.slane %v1171_v59, 1  ;;  %v1060_v53 = vadd.f32 %v1059_v6, %v1058_v24  ;;  %v1209_v37 = vrot.slane %v1208_v58, 1 }
 0x1cd   : > { %v1099_v30 = vadd.f32 %v1098_v10, %v1097_v9  ;;  %v1136_v60 = vadd.f32 %v1135_v18, %v1134_v46 }
 0x1ce   : > { %v1062_v11 = vsel %vm1061_vm12, 0.0, %v1060_v53  ;;  %v1173_v28 = vadd.f32 %v1172_v41, %v1171_v59  ;;  %v1210_v33 = vadd.f32 %v1209_v37, %v1208_v58 }
 0x1cf   : > { %v1212_v62 = vsel %vm1211_vm4, %v1062_v11, %v1099_v30 }
 0x1d0   : > { %v1214_v45 = vsel %vm1213_vm11, %v1212_v62, %v1136_v60 }
 0x1d1   : > { %v1216_v5 = vsel %vm1215_vm13, %v1214_v45, %v1173_v28 }
 0x1d2   : > { %v1218_v26 = vsel %vm1217_vm15, %v1216_v5, %v1210_v33 }
 0x1d3   : > { %1219 = vst [vmem:[%s189_s24] sm:$0x1f] %v1218_v26 }
 0x1d4 PF: > { %s12_s11 = sadd.s32 1, %s1405_s11   ;;  %s2822_s9 = smov %s1401_s10 }
 0x1d5   : > { %p9_p5 = scmp.ge.s32.totalorder %s12_s11, 4   ;;  %s2823_s10 = smov %s2825_s12 }
 0x1d7   :  { %11 = sbr.rel (!%p9_p5) target bundleno = 2 (0x2), region = 61 }

</bundles_post_ra>
